<compile_context>
chip_gen: v7x
topology: tpu7x:2x2x1
jax: 0.10.0
libtpu: 0.0.40
codegen_flags: <defaults>
</compile_context>

<pallas_src>
import functools

import jax
import jax.numpy as jnp
from jax.experimental import pallas as pl
from jax.experimental.pallas import tpu as pltpu

MIN_SCALE = 0.001
LN_EPS = 1e-5

# Rows of the packed bias / LayerNorm-affine table.
_R_BPROJ, _R_GPROJ, _R_BEPROJ = 0, 1, 2
_R_BPI1, _R_GPI1, _R_BEPI1 = 3, 4, 5
_R_BPI2, _R_GPI2, _R_BEPI2 = 6, 7, 8
_R_BAGG, _R_GAGG, _R_BEAGG = 9, 10, 11
_R_BPI3 = 12
_R_BLS1, _R_GLS1, _R_BELS1 = 13, 14, 15
_R_BOUT = 16
_NUM_TAB_ROWS = 17


def _mm(a, b):
    return jnp.dot(a, b, preferred_element_type=jnp.float32)


# ---------------------------------------------------------------------------
# The fused decoder kernel (invoked once, no grid, everything in VMEM).
# ---------------------------------------------------------------------------
def _decoder_kernel(
    # inputs
    x_ref, hid_ref,
    wproj_ref, wpi1h_ref, wpi1x_ref, wpi2_ref, wpi3_ref,
    waggh_ref, waggx_ref, wls1_ref, wout_ref,
    s192_ref, st192_ref, s384_ref, st384_ref, tab_ref,
    # outputs
    ls_ref, pi_ref,
):
    KH = wproj_ref.shape[1]          # K * H
    LS = wls1_ref.shape[1]           # 2 * K * H
    OUT = wout_ref.shape[1]          # 2 * K * F * 2
    K = pi_ref.shape[1]

    def row(r, w):                   # one row of the packed bias/affine table
        return tab_ref[r:r + 1, 0:w]

    def block_ln_relu(c, s_ref, st_ref, g, b):
        # `c` is already centered per H-feature block (centering folded into
        # the producing weights); per-block variance is broadcast back with
        # two tiny matmuls (block-mean indicator and its transpose).
        var = _mm(_mm(c * c, s_ref[...]), st_ref[...])
        return jnp.maximum(c * jax.lax.rsqrt(var + LN_EPS) * g + b, 0.0)

    x = x_ref[...]
    hid = hid_ref[...]

    # --- multihead_proj_global: Linear(H, K*H) + LN(K*H) + ReLU -------------
    c = _mm(x, wproj_ref[...]) + row(_R_BPROJ, KH)          # centered pre-act
    var = jnp.sum(c * c, axis=-1, keepdims=True) * (1.0 / KH)
    xg = jnp.maximum(c * jax.lax.rsqrt(var + LN_EPS) * row(_R_GPROJ, KH)
                     + row(_R_BEPROJ, KH), 0.0)             # [N, K*H]

    # --- pi head: cat((local, xg)) -> Lin LN ReLU -> Lin LN ReLU -> Lin(1) --
    c1 = _mm(hid, wpi1h_ref[...]) + _mm(xg, wpi1x_ref[...]) + row(_R_BPI1, KH)
    h1 = block_ln_relu(c1, s192_ref, st192_ref, row(_R_GPI1, KH),
                       row(_R_BEPI1, KH))
    c2 = _mm(h1, wpi2_ref[...]) + row(_R_BPI2, KH)
    h2 = block_ln_relu(c2, s192_ref, st192_ref, row(_R_GPI2, KH),
                       row(_R_BEPI2, KH))
    pim = _mm(h2, wpi3_ref[...])                            # [N, ceil8(K)]
    pi_ref[...] = pim[:, :K] + row(_R_BPI3, K)              # single [N, K] store

    # --- aggr_embed: cat((xg, local)) -> Linear + LN + ReLU ------------------
    ca = _mm(xg, waggx_ref[...]) + _mm(hid, waggh_ref[...]) + row(_R_BAGG, KH)
    agg = block_ln_relu(ca, s192_ref, st192_ref, row(_R_GAGG, KH),
                        row(_R_BEAGG, KH))

    # --- loc / scale first layers, stacked into one [K*H, 2*K*H] matmul -----
    cls = _mm(agg, wls1_ref[...]) + row(_R_BLS1, LS)
    hls = block_ln_relu(cls, s384_ref, st384_ref, row(_R_GLS1, LS),
                        row(_R_BELS1, LS))

    # --- final loc/scale projection: one matmul, one lane-dense store -------
    raw = _mm(hls, wout_ref[...]) + row(_R_BOUT, OUT)       # [N, 2*K*F*2]
    lane = jax.lax.broadcasted_iota(jnp.int32, raw.shape, 1)
    elu1 = (jnp.where(raw > 0.0, raw, jnp.exp(jnp.minimum(raw, 0.0)) - 1.0)
            + (1.0 + MIN_SCALE))
    ls_ref[...] = jnp.where(lane < OUT // 2, raw, elu1)


# ---------------------------------------------------------------------------
# "Natural" parameters, mirroring the PyTorch module / init_weights exactly:
# Linear weights xavier-uniform (stored [in, out]), biases zero,
# LayerNorm gamma=1 / beta=0.
# ---------------------------------------------------------------------------
def init_natural_params(key, H, F, K):
    ks = iter(jax.random.split(key, 16))
    F2 = F * 2

    def xavier(din, dout):
        bound = (6.0 / (din + dout)) ** 0.5
        return jax.random.uniform(next(ks), (din, dout), jnp.float32,
                                  -bound, bound)

    z = lambda d: jnp.zeros((d,), jnp.float32)
    o = lambda d: jnp.ones((d,), jnp.float32)

    return dict(
        w_proj=xavier(H, K * H), b_proj=z(K * H), g_proj=o(K * H), be_proj=z(K * H),
        w_pi1=xavier(2 * H, H), b_pi1=z(H), g_pi1=o(H), be_pi1=z(H),
        w_pi2=xavier(H, H), b_pi2=z(H), g_pi2=o(H), be_pi2=z(H),
        w_pi3=xavier(H, 1), b_pi3=z(1),
        w_agg=xavier(2 * H, H), b_agg=z(H), g_agg=o(H), be_agg=z(H),
        w_loc1=xavier(H, H), b_loc1=z(H), g_loc1=o(H), be_loc1=z(H),
        w_loc2=xavier(H, F2), b_loc2=z(F2),
        w_sc1=xavier(H, H), b_sc1=z(H), g_sc1=o(H), be_sc1=z(H),
        w_sc2=xavier(H, F2), b_sc2=z(F2),
    )


# ---------------------------------------------------------------------------
# Pack natural parameters into the block-structured layout the kernel uses.
# Done once, outside the kernel.
# ---------------------------------------------------------------------------
def pack_params(nat, H, F, K):
    F2 = F * 2
    KH = K * H
    KF2 = K * F2
    eyeK = jnp.eye(K, dtype=jnp.float32)

    def bdiag(w):                    # [H, d] per-mode weight -> [K*H, K*d]
        return jnp.kron(eyeK, w)

    def repcols(w):                  # shared-input weight -> [din, K*H]
        return jnp.tile(w, (1, K))

    def trow(v):                     # per-mode vector -> [K*d]
        return jnp.tile(v, K)

    def center_block(d, blk):        # I - per-block mean matrix
        nb = d // blk
        B = jnp.kron(jnp.eye(nb, dtype=jnp.float32),
                     jnp.full((blk, blk), 1.0 / blk, jnp.float32))
        return jnp.eye(d, dtype=jnp.float32) - B

    def s_pair(d, blk):              # block-mean indicator + broadcast-back
        nb = d // blk
        nbp = ((nb + 7) // 8) * 8    # pad contraction dims to 8 (zero cols/rows)
        S = jnp.kron(jnp.eye(nb, dtype=jnp.float32),
                     jnp.full((blk, 1), 1.0 / blk, jnp.float32))
        ST = jnp.kron(jnp.eye(nb, dtype=jnp.float32),
                      jnp.ones((1, blk), jnp.float32))
        return (jnp.pad(S, ((0, 0), (0, nbp - nb))),
                jnp.pad(ST, ((0, nbp - nb), (0, 0))))

    C_full = (jnp.eye(KH, dtype=jnp.float32)
              - jnp.full((KH, KH), 1.0 / KH, jnp.float32))
    C_192 = center_block(KH, H)
    C_384 = center_block(2 * KH, H)
    s192, st192 = s_pair(KH, H)
    s384, st384 = s_pair(2 * KH, H)

    # Weights with LayerNorm centering folded in (exact:  (xW+b)(I-B) = x(W(I-B)) + b(I-B)).
    w_proj = nat["w_proj"] @ C_full
    b_proj = nat["b_proj"] @ C_full

    w_pi1_h = repcols(nat["w_pi1"][:H]) @ C_192      # cat((local, xg)): rows 0:H = hidden_state
    w_pi1_x = bdiag(nat["w_pi1"][H:]) @ C_192        #                   rows H:2H = xg
    b_pi1 = trow(nat["b_pi1"]) @ C_192

    w_pi2 = bdiag(nat["w_pi2"]) @ C_192
    b_pi2 = trow(nat["b_pi2"]) @ C_192

    w_pi3 = jnp.kron(eyeK, nat["w_pi3"])             # [K*H, K]
    Kp = ((K + 7) // 8) * 8
    w_pi3 = jnp.pad(w_pi3, ((0, 0), (0, Kp - K)))    # MXU-friendly zero cols
    b_pi3 = jnp.tile(nat["b_pi3"], K)                # [K]

    w_agg_x = bdiag(nat["w_agg"][:H]) @ C_192        # cat((xg, local)): rows 0:H = xg
    w_agg_h = repcols(nat["w_agg"][H:]) @ C_192      #                   rows H:2H = hidden_state
    b_agg = trow(nat["b_agg"]) @ C_192

    w_ls1 = jnp.concatenate([bdiag(nat["w_loc1"]), bdiag(nat["w_sc1"])],
                            axis=1) @ C_384          # [K*H, 2*K*H]
    b_ls1 = jnp.concatenate([trow(nat["b_loc1"]), trow(nat["b_sc1"])]) @ C_384

    zero_blk = jnp.zeros((KH, KF2), jnp.float32)
    w_out = jnp.block([[bdiag(nat["w_loc2"]), zero_blk],
                       [zero_blk, bdiag(nat["w_sc2"])]])   # [2*K*H, 2*K*F*2]
    b_out = jnp.concatenate([trow(nat["b_loc2"]), trow(nat["b_sc2"])])

    # One packed table for every bias / gamma / beta row vector.
    W = 2 * KH

    def pad_row(v):
        return jnp.pad(v, (0, W - v.shape[0]))[None, :]

    tab = jnp.concatenate([
        pad_row(b_proj), pad_row(nat["g_proj"]), pad_row(nat["be_proj"]),
        pad_row(b_pi1), pad_row(trow(nat["g_pi1"])), pad_row(trow(nat["be_pi1"])),
        pad_row(b_pi2), pad_row(trow(nat["g_pi2"])), pad_row(trow(nat["be_pi2"])),
        pad_row(b_agg), pad_row(trow(nat["g_agg"])), pad_row(trow(nat["be_agg"])),
        pad_row(b_pi3),
        pad_row(b_ls1),
        pad_row(jnp.concatenate([trow(nat["g_loc1"]), trow(nat["g_sc1"])])),
        pad_row(jnp.concatenate([trow(nat["be_loc1"]), trow(nat["be_sc1"])])),
        pad_row(b_out),
    ], axis=0)
    assert tab.shape[0] == _NUM_TAB_ROWS

    return dict(w_proj=w_proj, w_pi1_h=w_pi1_h, w_pi1_x=w_pi1_x, w_pi2=w_pi2,
                w_pi3=w_pi3, w_agg_h=w_agg_h, w_agg_x=w_agg_x, w_ls1=w_ls1,
                w_out=w_out, s192=s192, st192=st192, s384=s384, st384=st384,
                tab=tab)


# ---------------------------------------------------------------------------
# Forward pass: one grid-less pallas_call; XLA only reshapes/transposes the
# lane-packed loc|scale output to [K, N, F, 2].
# ---------------------------------------------------------------------------
@functools.partial(jax.jit, static_argnames=("hidden_size", "future_steps",
                                             "num_modes"))
def mlp_decoder_forward(kparams, x_encode, hidden_state, cn,
                        *, hidden_size, future_steps, num_modes):
    del cn  # unused by the reference forward
    F, K = future_steps, num_modes
    N = x_encode.shape[0]
    kf2 = K * F * 2

    inputs = (
        x_encode, hidden_state,
        kparams["w_proj"], kparams["w_pi1_h"], kparams["w_pi1_x"],
        kparams["w_pi2"], kparams["w_pi3"],
        kparams["w_agg_h"], kparams["w_agg_x"],
        kparams["w_ls1"], kparams["w_out"],
        kparams["s192"], kparams["st192"], kparams["s384"], kparams["st384"],
        kparams["tab"],
    )

    vmem = pl.BlockSpec(memory_space=pltpu.MemorySpace.VMEM)
    ls, pi = pl.pallas_call(
        _decoder_kernel,
        out_shape=(
            jax.ShapeDtypeStruct((N, 2 * kf2), jnp.float32),  # [loc | scale]
            jax.ShapeDtypeStruct((N, K), jnp.float32),        # pi
        ),
        in_specs=[vmem] * len(inputs),
        out_specs=(vmem, vmem),
    )(*inputs)

    loc = ls[:, :kf2].reshape(N, K, F, 2).transpose(1, 0, 2, 3)
    scale = ls[:, kf2:].reshape(N, K, F, 2).transpose(1, 0, 2, 3)
    return loc, scale, pi


# ---------------------------------------------------------------------------
# Pure-JAX reference (mirrors the PyTorch forward exactly) for validation.
# ---------------------------------------------------------------------------
def reference_forward(nat, x, hid, H, F, K):
    def ln(v, g, b):
        m = jnp.mean(v, axis=-1, keepdims=True)
        c = v - m
        var = jnp.mean(c * c, axis=-1, keepdims=True)
        return c * jax.lax.rsqrt(var + LN_EPS) * g + b

    relu = lambda v: jnp.maximum(v, 0.0)

    xg = relu(ln(x @ nat["w_proj"] + nat["b_proj"], nat["g_proj"],
                 nat["be_proj"]))
    xg = jnp.transpose(xg.reshape(-1, K, H), (1, 0, 2))       # [K, N, H]
    local = jnp.broadcast_to(hid[None], (K,) + hid.shape)      # [K, N, H]

    h = relu(ln(jnp.concatenate([local, xg], -1) @ nat["w_pi1"] + nat["b_pi1"],
                nat["g_pi1"], nat["be_pi1"]))
    h = relu(ln(h @ nat["w_pi2"] + nat["b_pi2"], nat["g_pi2"], nat["be_pi2"]))
    pi = (h @ nat["w_pi3"] + nat["b_pi3"])[..., 0].T           # [N, K]

    out = relu(ln(jnp.concatenate([xg, local], -1) @ nat["w_agg"] + nat["b_agg"],
                  nat["g_agg"], nat["be_agg"]))
    hl = relu(ln(out @ nat["w_loc1"] + nat["b_loc1"], nat["g_loc1"],
                 nat["be_loc1"]))
    loc = (hl @ nat["w_loc2"] + nat["b_loc2"]).reshape(K, -1, F, 2)
    hs = relu(ln(out @ nat["w_sc1"] + nat["b_sc1"], nat["g_sc1"],
                 nat["be_sc1"]))
    raw = hs @ nat["w_sc2"] + nat["b_sc2"]
    elu = jnp.where(raw > 0.0, raw, jnp.exp(jnp.minimum(raw, 0.0)) - 1.0)
    scale = elu.reshape(K, -1, F, 2) + 1.0 + MIN_SCALE
    return loc, scale, pi


# ---------------------------------------------------------------------------
if __name__ == "__main__":
    HIDDEN = 32          # args.hidden_size
    PRED_LEN = 12        # args.pred_length (future_steps)
    FINAL_MODE = 6       # args.final_mode (num_modes)
    BATCH = 8            # number of agents / rows

    key = jax.random.PRNGKey(0)
    k_x, k_h, k_c = jax.random.split(key, 3)
    x_encode = jax.random.normal(k_x, (BATCH, HIDDEN), dtype=jnp.float32)
    hidden_state = jax.random.normal(k_h, (BATCH, HIDDEN), dtype=jnp.float32)
    cn = jax.random.normal(k_c, (BATCH, HIDDEN), dtype=jnp.float32)  # unused

    nat = init_natural_params(jax.random.PRNGKey(42), HIDDEN, PRED_LEN,
                              FINAL_MODE)
    kparams = pack_params(nat, HIDDEN, PRED_LEN, FINAL_MODE)

    loc, scale, pi = mlp_decoder_forward(
        kparams, x_encode, hidden_state, cn,
        hidden_size=HIDDEN, future_steps=PRED_LEN, num_modes=FINAL_MODE)
    jax.block_until_ready((loc, scale, pi))

    assert loc.shape == (FINAL_MODE, BATCH, PRED_LEN, 2), loc.shape
    assert scale.shape == (FINAL_MODE, BATCH, PRED_LEN, 2), scale.shape
    assert pi.shape == (BATCH, FINAL_MODE), pi.shape
    assert bool(jnp.all(jnp.isfinite(loc))), "loc must be finite"
    assert bool(jnp.all(jnp.isfinite(pi))), "pi must be finite"
    assert bool(jnp.all(scale > 0.0)), "scale must be positive"

    # Validate against a pure-JAX transcription of the PyTorch forward.
    loc_r, scale_r, pi_r = reference_forward(nat, x_encode, hidden_state,
                                             HIDDEN, PRED_LEN, FINAL_MODE)
    for name, got, want in (("loc", loc, loc_r), ("scale", scale, scale_r),
                            ("pi", pi, pi_r)):
        err = float(jnp.max(jnp.abs(got - want)))
        assert err < 1e-3, f"{name} mismatch vs reference (max abs err {err})"

    print("KERNEL_OK")
</pallas_src>

<mosaic_0001>
module attributes {stable_mosaic.version = 11 : i64} {
  func.func @_decoder_kernel(%arg0: memref<8x32xf32, #tpu.memory_space<vmem>>, %arg1: memref<8x32xf32, #tpu.memory_space<vmem>>, %arg2: memref<32x192xf32, #tpu.memory_space<vmem>>, %arg3: memref<32x192xf32, #tpu.memory_space<vmem>>, %arg4: memref<192x192xf32, #tpu.memory_space<vmem>>, %arg5: memref<192x192xf32, #tpu.memory_space<vmem>>, %arg6: memref<192x8xf32, #tpu.memory_space<vmem>>, %arg7: memref<32x192xf32, #tpu.memory_space<vmem>>, %arg8: memref<192x192xf32, #tpu.memory_space<vmem>>, %arg9: memref<192x384xf32, #tpu.memory_space<vmem>>, %arg10: memref<384x288xf32, #tpu.memory_space<vmem>>, %arg11: memref<192x8xf32, #tpu.memory_space<vmem>>, %arg12: memref<8x192xf32, #tpu.memory_space<vmem>>, %arg13: memref<384x16xf32, #tpu.memory_space<vmem>>, %arg14: memref<16x384xf32, #tpu.memory_space<vmem>>, %arg15: memref<17x384xf32, #tpu.memory_space<vmem>>, %arg16: memref<8x288xf32, #tpu.memory_space<vmem>>, %arg17: memref<8x6xf32, #tpu.memory_space<vmem>>) attributes {dimension_semantics = [], scalar_prefetch = 0 : i64, scratch_operands = 0 : i64, tpu.core_type = #tpu.core_type<tc>} {
    %c0 = arith.constant 0 : index
    %c0_0 = arith.constant 0 : index
    %0 = vector.load %arg0[%c0, %c0_0] : memref<8x32xf32, #tpu.memory_space<vmem>>, vector<8x32xf32>
    %c0_1 = arith.constant 0 : index
    %c0_2 = arith.constant 0 : index
    %1 = vector.load %arg1[%c0_1, %c0_2] : memref<8x32xf32, #tpu.memory_space<vmem>>, vector<8x32xf32>
    %c0_3 = arith.constant 0 : index
    %c0_4 = arith.constant 0 : index
    %2 = vector.load %arg2[%c0_3, %c0_4] : memref<32x192xf32, #tpu.memory_space<vmem>>, vector<32x192xf32>
    %cst = arith.constant dense<0.000000e+00> : vector<8x192xf32>
    %3 = tpu.matmul %0, %2, %cst {dimension_numbers = #tpu.dot_dimension_numbers<[1], [0], [0], [1], [0, 0, 1, 1], [], []>} : vector<8x32xf32>, vector<32x192xf32>, vector<8x192xf32> -> vector<8x192xf32>
    %c0_5 = arith.constant 0 : index
    %c0_6 = arith.constant 0 : index
    %4 = vector.load %arg15[%c0_5, %c0_6] : memref<17x384xf32, #tpu.memory_space<vmem>>, vector<1x192xf32>
    %5 = vector.broadcast %4 : vector<1x192xf32> to vector<8x192xf32>
    %6 = arith.addf %3, %5 : vector<8x192xf32>
    %7 = arith.mulf %6, %6 : vector<8x192xf32>
    %cst_7 = arith.constant dense<0.000000e+00> : vector<8xf32>
    %8 = vector.multi_reduction <add>, %7, %cst_7 [1] : vector<8x192xf32> to vector<8xf32>
    %9 = vector.shape_cast %8 : vector<8xf32> to vector<8x1xf32>
    %cst_8 = arith.constant 0.00520833349 : f32
    %10 = vector.broadcast %cst_8 : f32 to vector<8x1xf32>
    %11 = arith.mulf %9, %10 : vector<8x1xf32>
    %cst_9 = arith.constant 9.99999974E-6 : f32
    %12 = vector.broadcast %cst_9 : f32 to vector<8x1xf32>
    %13 = arith.addf %11, %12 : vector<8x1xf32>
    %14 = math.rsqrt %13 : vector<8x1xf32>
    %15 = vector.broadcast %14 : vector<8x1xf32> to vector<8x192xf32>
    %16 = arith.mulf %6, %15 : vector<8x192xf32>
    %c1 = arith.constant 1 : index
    %c0_10 = arith.constant 0 : index
    %17 = vector.load %arg15[%c1, %c0_10] : memref<17x384xf32, #tpu.memory_space<vmem>>, vector<1x192xf32>
    %18 = vector.broadcast %17 : vector<1x192xf32> to vector<8x192xf32>
    %19 = arith.mulf %16, %18 : vector<8x192xf32>
    %c2 = arith.constant 2 : index
    %c0_11 = arith.constant 0 : index
    %20 = vector.load %arg15[%c2, %c0_11] : memref<17x384xf32, #tpu.memory_space<vmem>>, vector<1x192xf32>
    %21 = vector.broadcast %20 : vector<1x192xf32> to vector<8x192xf32>
    %22 = arith.addf %19, %21 : vector<8x192xf32>
    %cst_12 = arith.constant 0.000000e+00 : f32
    %23 = vector.broadcast %cst_12 : f32 to vector<8x192xf32>
    %24 = arith.maximumf %22, %23 : vector<8x192xf32>
    %c0_13 = arith.constant 0 : index
    %c0_14 = arith.constant 0 : index
    %25 = vector.load %arg3[%c0_13, %c0_14] : memref<32x192xf32, #tpu.memory_space<vmem>>, vector<32x192xf32>
    %cst_15 = arith.constant dense<0.000000e+00> : vector<8x192xf32>
    %26 = tpu.matmul %1, %25, %cst_15 {dimension_numbers = #tpu.dot_dimension_numbers<[1], [0], [0], [1], [0, 0, 1, 1], [], []>} : vector<8x32xf32>, vector<32x192xf32>, vector<8x192xf32> -> vector<8x192xf32>
    %c0_16 = arith.constant 0 : index
    %c0_17 = arith.constant 0 : index
    %27 = vector.load %arg4[%c0_16, %c0_17] : memref<192x192xf32, #tpu.memory_space<vmem>>, vector<192x192xf32>
    %cst_18 = arith.constant dense<0.000000e+00> : vector<8x192xf32>
    %28 = tpu.matmul %24, %27, %cst_18 {dimension_numbers = #tpu.dot_dimension_numbers<[1], [0], [0], [1], [0, 0, 1, 1], [], []>} : vector<8x192xf32>, vector<192x192xf32>, vector<8x192xf32> -> vector<8x192xf32>
    %29 = arith.addf %26, %28 : vector<8x192xf32>
    %c3 = arith.constant 3 : index
    %c0_19 = arith.constant 0 : index
    %30 = vector.load %arg15[%c3, %c0_19] : memref<17x384xf32, #tpu.memory_space<vmem>>, vector<1x192xf32>
    %31 = vector.broadcast %30 : vector<1x192xf32> to vector<8x192xf32>
    %32 = arith.addf %29, %31 : vector<8x192xf32>
    %c4 = arith.constant 4 : index
    %c0_20 = arith.constant 0 : index
    %33 = vector.load %arg15[%c4, %c0_20] : memref<17x384xf32, #tpu.memory_space<vmem>>, vector<1x192xf32>
    %c5 = arith.constant 5 : index
    %c0_21 = arith.constant 0 : index
    %34 = vector.load %arg15[%c5, %c0_21] : memref<17x384xf32, #tpu.memory_space<vmem>>, vector<1x192xf32>
    %35 = arith.mulf %32, %32 : vector<8x192xf32>
    %c0_22 = arith.constant 0 : index
    %c0_23 = arith.constant 0 : index
    %36 = vector.load %arg11[%c0_22, %c0_23] : memref<192x8xf32, #tpu.memory_space<vmem>>, vector<192x8xf32>
    %cst_24 = arith.constant dense<0.000000e+00> : vector<8x8xf32>
    %37 = tpu.matmul %35, %36, %cst_24 {dimension_numbers = #tpu.dot_dimension_numbers<[1], [0], [0], [1], [0, 0, 1, 1], [], []>} : vector<8x192xf32>, vector<192x8xf32>, vector<8x8xf32> -> vector<8x8xf32>
    %c0_25 = arith.constant 0 : index
    %c0_26 = arith.constant 0 : index
    %38 = vector.load %arg12[%c0_25, %c0_26] : memref<8x192xf32, #tpu.memory_space<vmem>>, vector<8x192xf32>
    %cst_27 = arith.constant dense<0.000000e+00> : vector<8x192xf32>
    %39 = tpu.matmul %37, %38, %cst_27 {dimension_numbers = #tpu.dot_dimension_numbers<[1], [0], [0], [1], [0, 0, 1, 1], [], []>} : vector<8x8xf32>, vector<8x192xf32>, vector<8x192xf32> -> vector<8x192xf32>
    %cst_28 = arith.constant 9.99999974E-6 : f32
    %40 = vector.broadcast %cst_28 : f32 to vector<8x192xf32>
    %41 = arith.addf %39, %40 : vector<8x192xf32>
    %42 = math.rsqrt %41 : vector<8x192xf32>
    %43 = arith.mulf %32, %42 : vector<8x192xf32>
    %44 = vector.broadcast %33 : vector<1x192xf32> to vector<8x192xf32>
    %45 = arith.mulf %43, %44 : vector<8x192xf32>
    %46 = vector.broadcast %34 : vector<1x192xf32> to vector<8x192xf32>
    %47 = arith.addf %45, %46 : vector<8x192xf32>
    %cst_29 = arith.constant 0.000000e+00 : f32
    %48 = vector.broadcast %cst_29 : f32 to vector<8x192xf32>
    %49 = arith.maximumf %47, %48 : vector<8x192xf32>
    %c0_30 = arith.constant 0 : index
    %c0_31 = arith.constant 0 : index
    %50 = vector.load %arg5[%c0_30, %c0_31] : memref<192x192xf32, #tpu.memory_space<vmem>>, vector<192x192xf32>
    %cst_32 = arith.constant dense<0.000000e+00> : vector<8x192xf32>
    %51 = tpu.matmul %49, %50, %cst_32 {dimension_numbers = #tpu.dot_dimension_numbers<[1], [0], [0], [1], [0, 0, 1, 1], [], []>} : vector<8x192xf32>, vector<192x192xf32>, vector<8x192xf32> -> vector<8x192xf32>
    %c6 = arith.constant 6 : index
    %c0_33 = arith.constant 0 : index
    %52 = vector.load %arg15[%c6, %c0_33] : memref<17x384xf32, #tpu.memory_space<vmem>>, vector<1x192xf32>
    %53 = vector.broadcast %52 : vector<1x192xf32> to vector<8x192xf32>
    %54 = arith.addf %51, %53 : vector<8x192xf32>
    %c7 = arith.constant 7 : index
    %c0_34 = arith.constant 0 : index
    %55 = vector.load %arg15[%c7, %c0_34] : memref<17x384xf32, #tpu.memory_space<vmem>>, vector<1x192xf32>
    %c8 = arith.constant 8 : index
    %c0_35 = arith.constant 0 : index
    %56 = vector.load %arg15[%c8, %c0_35] : memref<17x384xf32, #tpu.memory_space<vmem>>, vector<1x192xf32>
    %57 = arith.mulf %54, %54 : vector<8x192xf32>
    %c0_36 = arith.constant 0 : index
    %c0_37 = arith.constant 0 : index
    %58 = vector.load %arg11[%c0_36, %c0_37] : memref<192x8xf32, #tpu.memory_space<vmem>>, vector<192x8xf32>
    %cst_38 = arith.constant dense<0.000000e+00> : vector<8x8xf32>
    %59 = tpu.matmul %57, %58, %cst_38 {dimension_numbers = #tpu.dot_dimension_numbers<[1], [0], [0], [1], [0, 0, 1, 1], [], []>} : vector<8x192xf32>, vector<192x8xf32>, vector<8x8xf32> -> vector<8x8xf32>
    %c0_39 = arith.constant 0 : index
    %c0_40 = arith.constant 0 : index
    %60 = vector.load %arg12[%c0_39, %c0_40] : memref<8x192xf32, #tpu.memory_space<vmem>>, vector<8x192xf32>
    %cst_41 = arith.constant dense<0.000000e+00> : vector<8x192xf32>
    %61 = tpu.matmul %59, %60, %cst_41 {dimension_numbers = #tpu.dot_dimension_numbers<[1], [0], [0], [1], [0, 0, 1, 1], [], []>} : vector<8x8xf32>, vector<8x192xf32>, vector<8x192xf32> -> vector<8x192xf32>
    %cst_42 = arith.constant 9.99999974E-6 : f32
    %62 = vector.broadcast %cst_42 : f32 to vector<8x192xf32>
    %63 = arith.addf %61, %62 : vector<8x192xf32>
    %64 = math.rsqrt %63 : vector<8x192xf32>
    %65 = arith.mulf %54, %64 : vector<8x192xf32>
    %66 = vector.broadcast %55 : vector<1x192xf32> to vector<8x192xf32>
    %67 = arith.mulf %65, %66 : vector<8x192xf32>
    %68 = vector.broadcast %56 : vector<1x192xf32> to vector<8x192xf32>
    %69 = arith.addf %67, %68 : vector<8x192xf32>
    %cst_43 = arith.constant 0.000000e+00 : f32
    %70 = vector.broadcast %cst_43 : f32 to vector<8x192xf32>
    %71 = arith.maximumf %69, %70 : vector<8x192xf32>
    %c0_44 = arith.constant 0 : index
    %c0_45 = arith.constant 0 : index
    %72 = vector.load %arg6[%c0_44, %c0_45] : memref<192x8xf32, #tpu.memory_space<vmem>>, vector<192x8xf32>
    %cst_46 = arith.constant dense<0.000000e+00> : vector<8x8xf32>
    %73 = tpu.matmul %71, %72, %cst_46 {dimension_numbers = #tpu.dot_dimension_numbers<[1], [0], [0], [1], [0, 0, 1, 1], [], []>} : vector<8x192xf32>, vector<192x8xf32>, vector<8x8xf32> -> vector<8x8xf32>
    %74 = vector.extract_strided_slice %73 {offsets = [0, 0], sizes = [8, 6], strides = [1, 1]} : vector<8x8xf32> to vector<8x6xf32>
    %c12 = arith.constant 12 : index
    %c0_47 = arith.constant 0 : index
    %75 = vector.load %arg15[%c12, %c0_47] : memref<17x384xf32, #tpu.memory_space<vmem>>, vector<1x6xf32>
    %76 = vector.broadcast %75 : vector<1x6xf32> to vector<8x6xf32>
    %77 = arith.addf %74, %76 : vector<8x6xf32>
    %c0_48 = arith.constant 0 : index
    %c0_49 = arith.constant 0 : index
    %78 = vector.load %arg17[%c0_48, %c0_49] : memref<8x6xf32, #tpu.memory_space<vmem>>, vector<8x6xf32>
    tpu.vector_store %arg17[%c0_48, %c0_49], %77 {strides = array<i32>} : memref<8x6xf32, #tpu.memory_space<vmem>>, vector<8x6xf32>,
    %c0_50 = arith.constant 0 : index
    %c0_51 = arith.constant 0 : index
    %79 = vector.load %arg8[%c0_50, %c0_51] : memref<192x192xf32, #tpu.memory_space<vmem>>, vector<192x192xf32>
    %cst_52 = arith.constant dense<0.000000e+00> : vector<8x192xf32>
    %80 = tpu.matmul %24, %79, %cst_52 {dimension_numbers = #tpu.dot_dimension_numbers<[1], [0], [0], [1], [0, 0, 1, 1], [], []>} : vector<8x192xf32>, vector<192x192xf32>, vector<8x192xf32> -> vector<8x192xf32>
    %c0_53 = arith.constant 0 : index
    %c0_54 = arith.constant 0 : index
    %81 = vector.load %arg7[%c0_53, %c0_54] : memref<32x192xf32, #tpu.memory_space<vmem>>, vector<32x192xf32>
    %cst_55 = arith.constant dense<0.000000e+00> : vector<8x192xf32>
    %82 = tpu.matmul %1, %81, %cst_55 {dimension_numbers = #tpu.dot_dimension_numbers<[1], [0], [0], [1], [0, 0, 1, 1], [], []>} : vector<8x32xf32>, vector<32x192xf32>, vector<8x192xf32> -> vector<8x192xf32>
    %83 = arith.addf %80, %82 : vector<8x192xf32>
    %c9 = arith.constant 9 : index
    %c0_56 = arith.constant 0 : index
    %84 = vector.load %arg15[%c9, %c0_56] : memref<17x384xf32, #tpu.memory_space<vmem>>, vector<1x192xf32>
    %85 = vector.broadcast %84 : vector<1x192xf32> to vector<8x192xf32>
    %86 = arith.addf %83, %85 : vector<8x192xf32>
    %c10 = arith.constant 10 : index
    %c0_57 = arith.constant 0 : index
    %87 = vector.load %arg15[%c10, %c0_57] : memref<17x384xf32, #tpu.memory_space<vmem>>, vector<1x192xf32>
    %c11 = arith.constant 11 : index
    %c0_58 = arith.constant 0 : index
    %88 = vector.load %arg15[%c11, %c0_58] : memref<17x384xf32, #tpu.memory_space<vmem>>, vector<1x192xf32>
    %89 = arith.mulf %86, %86 : vector<8x192xf32>
    %c0_59 = arith.constant 0 : index
    %c0_60 = arith.constant 0 : index
    %90 = vector.load %arg11[%c0_59, %c0_60] : memref<192x8xf32, #tpu.memory_space<vmem>>, vector<192x8xf32>
    %cst_61 = arith.constant dense<0.000000e+00> : vector<8x8xf32>
    %91 = tpu.matmul %89, %90, %cst_61 {dimension_numbers = #tpu.dot_dimension_numbers<[1], [0], [0], [1], [0, 0, 1, 1], [], []>} : vector<8x192xf32>, vector<192x8xf32>, vector<8x8xf32> -> vector<8x8xf32>
    %c0_62 = arith.constant 0 : index
    %c0_63 = arith.constant 0 : index
    %92 = vector.load %arg12[%c0_62, %c0_63] : memref<8x192xf32, #tpu.memory_space<vmem>>, vector<8x192xf32>
    %cst_64 = arith.constant dense<0.000000e+00> : vector<8x192xf32>
    %93 = tpu.matmul %91, %92, %cst_64 {dimension_numbers = #tpu.dot_dimension_numbers<[1], [0], [0], [1], [0, 0, 1, 1], [], []>} : vector<8x8xf32>, vector<8x192xf32>, vector<8x192xf32> -> vector<8x192xf32>
    %cst_65 = arith.constant 9.99999974E-6 : f32
    %94 = vector.broadcast %cst_65 : f32 to vector<8x192xf32>
    %95 = arith.addf %93, %94 : vector<8x192xf32>
    %96 = math.rsqrt %95 : vector<8x192xf32>
    %97 = arith.mulf %86, %96 : vector<8x192xf32>
    %98 = vector.broadcast %87 : vector<1x192xf32> to vector<8x192xf32>
    %99 = arith.mulf %97, %98 : vector<8x192xf32>
    %100 = vector.broadcast %88 : vector<1x192xf32> to vector<8x192xf32>
    %101 = arith.addf %99, %100 : vector<8x192xf32>
    %cst_66 = arith.constant 0.000000e+00 : f32
    %102 = vector.broadcast %cst_66 : f32 to vector<8x192xf32>
    %103 = arith.maximumf %101, %102 : vector<8x192xf32>
    %c0_67 = arith.constant 0 : index
    %c0_68 = arith.constant 0 : index
    %104 = vector.load %arg9[%c0_67, %c0_68] : memref<192x384xf32, #tpu.memory_space<vmem>>, vector<192x384xf32>
    %cst_69 = arith.constant dense<0.000000e+00> : vector<8x384xf32>
    %105 = tpu.matmul %103, %104, %cst_69 {dimension_numbers = #tpu.dot_dimension_numbers<[1], [0], [0], [1], [0, 0, 1, 1], [], []>} : vector<8x192xf32>, vector<192x384xf32>, vector<8x384xf32> -> vector<8x384xf32>
    %c13 = arith.constant 13 : index
    %c0_70 = arith.constant 0 : index
    %106 = vector.load %arg15[%c13, %c0_70] : memref<17x384xf32, #tpu.memory_space<vmem>>, vector<1x384xf32>
    %107 = vector.broadcast %106 : vector<1x384xf32> to vector<8x384xf32>
    %108 = arith.addf %105, %107 : vector<8x384xf32>
    %c14 = arith.constant 14 : index
    %c0_71 = arith.constant 0 : index
    %109 = vector.load %arg15[%c14, %c0_71] : memref<17x384xf32, #tpu.memory_space<vmem>>, vector<1x384xf32>
    %c15 = arith.constant 15 : index
    %c0_72 = arith.constant 0 : index
    %110 = vector.load %arg15[%c15, %c0_72] : memref<17x384xf32, #tpu.memory_space<vmem>>, vector<1x384xf32>
    %111 = arith.mulf %108, %108 : vector<8x384xf32>
    %c0_73 = arith.constant 0 : index
    %c0_74 = arith.constant 0 : index
    %112 = vector.load %arg13[%c0_73, %c0_74] : memref<384x16xf32, #tpu.memory_space<vmem>>, vector<384x16xf32>
    %cst_75 = arith.constant dense<0.000000e+00> : vector<8x16xf32>
    %113 = tpu.matmul %111, %112, %cst_75 {dimension_numbers = #tpu.dot_dimension_numbers<[1], [0], [0], [1], [0, 0, 1, 1], [], []>} : vector<8x384xf32>, vector<384x16xf32>, vector<8x16xf32> -> vector<8x16xf32>
    %c0_76 = arith.constant 0 : index
    %c0_77 = arith.constant 0 : index
    %114 = vector.load %arg14[%c0_76, %c0_77] : memref<16x384xf32, #tpu.memory_space<vmem>>, vector<16x384xf32>
    %cst_78 = arith.constant dense<0.000000e+00> : vector<8x384xf32>
    %115 = tpu.matmul %113, %114, %cst_78 {dimension_numbers = #tpu.dot_dimension_numbers<[1], [0], [0], [1], [0, 0, 1, 1], [], []>} : vector<8x16xf32>, vector<16x384xf32>, vector<8x384xf32> -> vector<8x384xf32>
    %cst_79 = arith.constant 9.99999974E-6 : f32
    %116 = vector.broadcast %cst_79 : f32 to vector<8x384xf32>
    %117 = arith.addf %115, %116 : vector<8x384xf32>
    %118 = math.rsqrt %117 : vector<8x384xf32>
    %119 = arith.mulf %108, %118 : vector<8x384xf32>
    %120 = vector.broadcast %109 : vector<1x384xf32> to vector<8x384xf32>
    %121 = arith.mulf %119, %120 : vector<8x384xf32>
    %122 = vector.broadcast %110 : vector<1x384xf32> to vector<8x384xf32>
    %123 = arith.addf %121, %122 : vector<8x384xf32>
    %cst_80 = arith.constant 0.000000e+00 : f32
    %124 = vector.broadcast %cst_80 : f32 to vector<8x384xf32>
    %125 = arith.maximumf %123, %124 : vector<8x384xf32>
    %c0_81 = arith.constant 0 : index
    %c0_82 = arith.constant 0 : index
    %126 = vector.load %arg10[%c0_81, %c0_82] : memref<384x288xf32, #tpu.memory_space<vmem>>, vector<384x288xf32>
    %cst_83 = arith.constant dense<0.000000e+00> : vector<8x288xf32>
    %127 = tpu.matmul %125, %126, %cst_83 {dimension_numbers = #tpu.dot_dimension_numbers<[1], [0], [0], [1], [0, 0, 1, 1], [], []>} : vector<8x384xf32>, vector<384x288xf32>, vector<8x288xf32> -> vector<8x288xf32>
    %c16 = arith.constant 16 : index
    %c0_84 = arith.constant 0 : index
    %128 = vector.load %arg15[%c16, %c0_84] : memref<17x384xf32, #tpu.memory_space<vmem>>, vector<1x288xf32>
    %129 = vector.broadcast %128 : vector<1x288xf32> to vector<8x288xf32>
    %130 = arith.addf %127, %129 : vector<8x288xf32>
    %131 = tpu.iota {dimensions = array<i32: 1>} : vector<8x288xi32>
    %cst_85 = arith.constant 0.000000e+00 : f32
    %132 = vector.broadcast %cst_85 : f32 to vector<8x288xf32>
    %133 = arith.cmpf ogt, %130, %132 : vector<8x288xf32>
    %cst_86 = arith.constant 0.000000e+00 : f32
    %134 = vector.broadcast %cst_86 : f32 to vector<8x288xf32>
    %135 = arith.minimumf %130, %134 : vector<8x288xf32>
    %136 = math.exp %135 : vector<8x288xf32>
    %cst_87 = arith.constant 1.000000e+00 : f32
    %137 = vector.broadcast %cst_87 : f32 to vector<8x288xf32>
    %138 = arith.subf %136, %137 : vector<8x288xf32>
    %139 = arith.select %133, %130, %138 : vector<8x288xi1>, vector<8x288xf32>
    %cst_88 = arith.constant 1.001000e+00 : f32
    %140 = vector.broadcast %cst_88 : f32 to vector<8x288xf32>
    %141 = arith.addf %139, %140 : vector<8x288xf32>
    %c144_i32 = arith.constant 144 : i32
    %142 = vector.broadcast %c144_i32 : i32 to vector<8x288xi32>
    %143 = arith.cmpi slt, %131, %142 : vector<8x288xi32>
    %144 = arith.select %143, %130, %141 : vector<8x288xi1>, vector<8x288xf32>
    %c0_89 = arith.constant 0 : index
    %c0_90 = arith.constant 0 : index
    %145 = vector.load %arg16[%c0_89, %c0_90] : memref<8x288xf32, #tpu.memory_space<vmem>>, vector<8x288xf32>
    tpu.vector_store %arg16[%c0_89, %c0_90], %144 {strides = array<i32>} : memref<8x288xf32, #tpu.memory_space<vmem>>, vector<8x288xf32>,
    return
  }
}

</mosaic_0001>

<bundles_post_ra>
// kernel: mlp_decoder_forward.1
= control target key start
LH: loop header
LB: loop body
LE: loop exit
PB: predicated region body
PF: predicated region fallthrough
CT: control target
= control target key end

     0   :  { %s5528_s0 = inlined_call_operand.vmem [shape: f32[8,32], index: 0, kind: input, shape index: {}]   ;;  %s5529_s1 = inlined_call_operand.hbm [shape: f32[8,32], index: 1, kind: input, shape index: {}]   ;;  %s5530_s2 = inlined_call_operand.vmem [shape: f32[32,192], index: 2, kind: input, shape index: {}]   ;;  %s5531_s3 = inlined_call_operand.vmem [shape: f32[32,192], index: 3, kind: input, shape index: {}]   ;;  %s5532_s4 = inlined_call_operand.vmem [shape: f32[192,192], index: 4, kind: input, shape index: {}]   ;;  %s5533_s5 = inlined_call_operand.vmem [shape: f32[192,192], index: 5, kind: input, shape index: {}]   ;;  %s5534_s6 = inlined_call_operand.vmem [shape: f32[192,8], index: 6, kind: input, shape index: {}]   ;;  %s5535_s7 = inlined_call_operand.vmem [shape: f32[32,192], index: 7, kind: input, shape index: {}]   ;;  %s5536_s8 = inlined_call_operand.vmem [shape: f32[192,192], index: 8, kind: input, shape index: {}]   ;;  %s5537_s9 = inlined_call_operand.vmem [shape: f32[192,384], index: 9, kind: input, shape index: {}]   ;;  %s5538_s10 = inlined_call_operand.vmem [shape: f32[384,288], index: 10, kind: input, shape index: {}]   ;;  %s5539_s11 = inlined_call_operand.vmem [shape: f32[192,8], index: 11, kind: input, shape index: {}]   ;;  %s5540_s12 = inlined_call_operand.vmem [shape: f32[8,192], index: 12, kind: input, shape index: {}]   ;;  %s5541_s13 = inlined_call_operand.vmem [shape: f32[384,16], index: 13, kind: input, shape index: {}]   ;;  %s5542_s14 = inlined_call_operand.hbm [shape: f32[16,384], index: 14, kind: input, shape index: {}]   ;;  %s5543_s15 = inlined_call_operand.vmem [shape: f32[17,384], index: 15, kind: input, shape index: {}]   ;;  %s5544_s16 = inlined_call_operand.vmem [shape: f32[8,288], index: 16, kind: output, shape index: {0}]   ;;  %s5545_s17 = inlined_call_operand.hbm [shape: f32[8,6], index: 17, kind: output, shape index: {1}]  }
   0x1   :  { %5547 = sst [smem:[#allocation11_spill]] %s5528_s0 }
   0x2   :  { %5548 = sst [smem:[#allocation12_spill]] %s5529_s1 }
   0x3   :  { %23 = vsyncpa [#allocation3], 0 }
   0x4   :  { %24 = vsyncpa [#allocation6], 0 }
   0x5   :  { %25 = vsyncpa [#allocation4], 0  ;;  %s3566_s24 = smov [#allocation2]   ;;  %s3567_s26 = smov [#allocation5]  }
   0x6   :  { %s34_s25 = sshll.u32 %s3566_s24, 4  ;;  %s67_s27 = sshll.u32 %s3567_s26, 4  ;;  %s35_s25 = int_to_ptr.vmem [resolvable:$true] %s34_s25  ;;  %s3664_s27 = int_to_ptr.vmem [resolvable:$true] %s67_s27 }
   0x7   :  { %s5549_s0 = sld [smem:[#allocation12_spill]] }
   0xd   :  { %s3494_s30 = scalar_lea.hbm %s5549_s0, 128 }
   0xe   :  { %p3495_p0 = scmp.ne.s32.totalorder %s5549_s0, %s3494_s30  ;;  %p3498_p1 = scmp.lt.u32.totalorder %s3494_s30, %s5549_s0 }
  0x10   :  { %p3500_p2 = pnand %p3498_p1, %p3495_p0 }
  0x12   :  { %3503 = shalt.err (!%p3500_p2)
}
  0x13   :  { %s3504_s21 = scalar_lea.vmem %s35_s25, 128  ;;  %p3509_p4 = scmp.lt.s32.totalorder %s35_s25, %s35_s25 }
  0x14   :  { %p3505_p3 = scmp.ne.s32.totalorder %s35_s25, %s3504_s21  ;;  %p3510_p5 = scmp.lt.s32.totalorder %s3504_s21, %s3504_s21 }
  0x16   :  { %p3511_p6 = por %p3510_p5, %p3509_p4 }
  0x18   :  { %p3512_p7 = pnand %p3511_p6, %p3505_p3 }
  0x1a   :  { %3515 = shalt.err (!%p3512_p7)
}
  0x1b   :  { %37 = dma.hbm_to_vmem [thread:$0]  %s5549_s0, 128, %s35_s25, [#allocation3]  }
  0x1c   :  { %s3516_s28 = scalar_lea.hbm %s5542_s14, 768 }
  0x1d   :  { %p3517_p8 = scmp.ne.s32.totalorder %s5542_s14, %s3516_s28  ;;  %p3520_p9 = scmp.lt.u32.totalorder %s3516_s28, %s5542_s14 }
  0x1f   :  { %p3522_p10 = pnand %p3520_p9, %p3517_p8 }
  0x21   :  { %3525 = shalt.err (!%p3522_p10)
}
  0x22   :  { %s3526_s1 = scalar_lea.vmem %s3664_s27, 768  ;;  %p3531_p12 = scmp.lt.s32.totalorder %s3664_s27, %s3664_s27 }
  0x23   :  { %p3527_p11 = scmp.ne.s32.totalorder %s3664_s27, %s3526_s1  ;;  %p3532_p13 = scmp.lt.s32.totalorder %s3526_s1, %s3526_s1 }
  0x25   :  { %p3533_p0 = por %p3532_p13, %p3531_p12 }
  0x27   :  { %p3534_p1 = pnand %p3533_p0, %p3527_p11 }
  0x29   :  { %3537 = shalt.err (!%p3534_p1)
}
  0x2a   :  { %s3568_s25 = smov 384   ;;  %s3569_s0 = smov 24  }
  0x2b   :  { %73 = dma.hbm_to_vmem [thread:$0]  %s5542_s14, 768, %s3664_s27, [#allocation6], %s3568_s25, %s3568_s25, %s3569_s0  }
  0x2c   :  { %3560 = dma.done.wait [#allocation3], 128  }
  0x2d   :  { %3561 = vsyncadd [#allocation3], 4294967168 }
  0x2e   :  { %3562 = dma.done.wait [#allocation6], 768  }
  0x2f   :  { %3563 = vsyncadd [#allocation6], 4294966528  ;;  %v3570_v0 = vmov 0.0   ;;  %v85_v1 = vld [vmem:[%s5530_s2 + $0x8] sm:$0xff]  ;;  %v87_v2 = vld [vmem:[%s5530_s2 + $0x18] sm:$0xff]  ;;  %s5550_s24 = sld [smem:[#allocation11_spill]]  ;;  %v94_v50 = vlaneseq }
  0x30   :  { %172 = vmatprep.mubr.f32.mxu1 %v3570_v0  ;;  %v84_v3 = vld [vmem:[%s5530_s2] sm:$0xff]  ;;  %v2843_v4 = vpack.c.bf16 %v87_v2, %v85_v1  ;;  %v86_v5 = vld [vmem:[%s5530_s2 + $0x10] sm:$0xff]  ;;  %v89_v6 = vld [vmem:[%s5530_s2 + $0x28] sm:$0xff]  ;;  %vm104_vm0 = vcmask 261120   ;;  %vm181_vm1 = vcmask 523264   ;;  %vm547_vm2 = vcmask 64512  }
  0x31   :  { %v91_v7 = vld [vmem:[%s5530_s2 + $0x38] sm:$0xff]  ;;  %v2845_v8 = vpack.c.bf16 %v86_v5, %v84_v3  ;;  %v88_v10 = vld [vmem:[%s5530_s2 + $0x20] sm:$0xff]  ;;  %v90_v11 = vld [vmem:[%s5530_s2 + $0x30] sm:$0xff]  ;;  %v3797_v51 = vshrl.u32 %v94_v50, 7  ;;  %vm1073_vm3 = vcmask 48128   ;;  %vm3572_vm4 = vmmov 0  }
  0x32   :  { %v2847_v9 = vpack.c.bf16 %v91_v7, %v89_v6  ;;  %2844 = vmatprep.subr.bf16.mxu1 %v2843_v4  ;;  %v2849_v12 = vpack.c.bf16 %v90_v11, %v88_v10  ;;  %v232_v14 = vld [vmem:[%s5532_s4 + $0x8] sm:$0xff]  ;;  %v234_v15 = vld [vmem:[%s5532_s4 + $0x18] sm:$0xff]  ;;  %v231_v16 = vld [vmem:[%s5532_s4] sm:$0xff]  ;;  %vm1934_vm5 = vcmask 130048   ;;  %s3573_s18 = smov [#allocation7]  }
  0x33   :  { %2846 = vmatpush1.bf16.msra.mxu1 %v2845_v8  ;;  %v2851_v17 = vpack.c.bf16 %v234_v15, %v232_v14  ;;  %v233_v18 = vld [vmem:[%s5532_s4 + $0x10] sm:$0xff]  ;;  %v236_v19 = vld [vmem:[%s5532_s4 + $0x28] sm:$0xff]  ;;  %v238_v20 = vld [vmem:[%s5532_s4 + $0x38] sm:$0xff]  ;;  %v3800_v52 = vsub.s32 0, %v3797_v51  ;;  %v3806_v54 = vsub.s32 1, %v3797_v51  ;;  %s2612_s30 = sshll.u32 %s3573_s18, 4  ;;  %s2613_s30 = int_to_ptr.vmem [resolvable:$true] %s2612_s30 }
  0x34   :  { %2848 = vmatprep.subr.bf16.mxu1 %v2847_v9  ;;  %v2853_v21 = vpack.c.bf16 %v233_v18, %v231_v16  ;;  %v2855_v22 = vpack.c.bf16 %v238_v20, %v236_v19  ;;  %v235_v23 = vld [vmem:[%s5532_s4 + $0x20] sm:$0xff]  ;;  %v237_v24 = vld [vmem:[%s5532_s4 + $0x30] sm:$0xff]  ;;  %v240_v25 = vld [vmem:[%s5532_s4 + $0x48] sm:$0xff]  ;;  %p3543_p3 = scmp.lt.s32.totalorder %s2613_s30, %s2613_s30 }
  0x35   :  { %v82_v13 = vld [vmem:[%s5550_s24] sm:$0xff]  ;;  %v242_v26 = vld [vmem:[%s5532_s4 + $0x58] sm:$0xff]  ;;  %v2857_v27 = vpack.c.bf16 %v237_v24, %v235_v23  ;;  %v241_v30 = vld [vmem:[%s5532_s4 + $0x50] sm:$0xff] }
  0x36   :  { %v2859_v28 = vpack.c.bf16 %v242_v26, %v240_v25  ;;  %v239_v29 = vld [vmem:[%s5532_s4 + $0x40] sm:$0xff]  ;;  %v244_v31 = vld [vmem:[%s5532_s4 + $0x68] sm:$0xff]  ;;  %v246_v32 = vld [vmem:[%s5532_s4 + $0x78] sm:$0xff] }
  0x37   :  { %2850 = vmatpush1.bf16.msra.mxu1 %v2849_v12  ;;  %v2861_v33 = vpack.c.bf16 %v241_v30, %v239_v29  ;;  %v2863_v34 = vpack.c.bf16 %v246_v32, %v244_v31  ;;  %v243_v35 = vld [vmem:[%s5532_s4 + $0x60] sm:$0xff]  ;;  %v245_v36 = vld [vmem:[%s5532_s4 + $0x70] sm:$0xff]  ;;  %v248_v37 = vld [vmem:[%s5532_s4 + $0x88] sm:$0xff] }
  0x38   :  { %2852 = vmatprep.subr.bf16.mxu1 %v2851_v17  ;;  %v250_v38 = vld [vmem:[%s5532_s4 + $0x98] sm:$0xff]  ;;  %v2865_v39 = vpack.c.bf16 %v245_v36, %v243_v35  ;;  %v247_v41 = vld [vmem:[%s5532_s4 + $0x80] sm:$0xff]  ;;  %v249_v42 = vld [vmem:[%s5532_s4 + $0x90] sm:$0xff] }
  0x39   :  { %v2867_v40 = vpack.c.bf16 %v250_v38, %v248_v37  ;;  %v252_v43 = vld [vmem:[%s5532_s4 + $0xa8] sm:$0xff]  ;;  %v254_v44 = vld [vmem:[%s5532_s4 + $0xb8] sm:$0xff]  ;;  %v2869_v45 = vpack.c.bf16 %v249_v42, %v247_v41  ;;  %v251_v47 = vld [vmem:[%s5532_s4 + $0xa0] sm:$0xff] }
  0x3a   :  { %2624 = vmatmul.mubr.msk.f32.vlgmr.msra.gmra.mrb[0].mxu1 %vm104_vm0, %v82_v13  ;;  %v2871_v46 = vpack.c.bf16 %v254_v44, %v252_v43  ;;  %v253_v48 = vld [vmem:[%s5532_s4 + $0xb0] sm:$0xff]  ;;  %v92_v53 = vld [vmem:[%s5543_s15] ss:$8 sm:$0x3]  ;;  %v258_v3 = vld [vmem:[%s5532_s4 + $0xd8] sm:$0xff]  ;;  %v3571_v44 = vmov 0.0|0.0  }
  0x3b   :  { %2854 = vmatpush1.bf16.msra.mxu1 %v2853_v21  ;;  %v2873_v49 = vpack.c.bf16 %v253_v48, %v251_v47  ;;  %v97_v55 = vrot.slane %v92_v53, %v3800_v52  ;;  %v101_v56 = vrot.slane %v92_v53, %v3806_v54  ;;  %v256_v2 = vld [vmem:[%s5532_s4 + $0xc8] sm:$0xff]  ;;  %v255_v5 = vld [vmem:[%s5532_s4 + $0xc0] sm:$0xff]  ;;  %v257_v6 = vld [vmem:[%s5532_s4 + $0xd0] sm:$0xff]  ;;  %2907 = vmatprep.subr.bf16.mxu0 %v3571_v44 }
  0x3c   :  { %2856 = vmatprep.subr.bf16.mxu1 %v2855_v22  ;;  %v2875_v4 = vpack.c.bf16 %v258_v3, %v256_v2  ;;  %v2877_v7 = vpack.c.bf16 %v257_v6, %v255_v5  ;;  %v260_v8 = vld [vmem:[%s5532_s4 + $0xe8] sm:$0xff]  ;;  %v262_v9 = vld [vmem:[%s5532_s4 + $0xf8] sm:$0xff]  ;;  %v259_v11 = vld [vmem:[%s5532_s4 + $0xe0] sm:$0xff] }
  0x3d   :  { %v2879_v10 = vpack.c.bf16 %v262_v9, %v260_v8  ;;  %v261_v12 = vld [vmem:[%s5532_s4 + $0xf0] sm:$0xff]  ;;  %v264_v14 = vld [vmem:[%s5532_s4 + $0x108] sm:$0xff]  ;;  %v266_v15 = vld [vmem:[%s5532_s4 + $0x118] sm:$0xff] }
  0x3e   :  { %v2881_v13 = vpack.c.bf16 %v261_v12, %v259_v11  ;;  %v2883_v16 = vpack.c.bf16 %v266_v15, %v264_v14  ;;  %v263_v17 = vld [vmem:[%s5532_s4 + $0x100] sm:$0xff]  ;;  %v265_v18 = vld [vmem:[%s5532_s4 + $0x110] sm:$0xff]  ;;  %v268_v20 = vld [vmem:[%s5532_s4 + $0x128] sm:$0xff] }
  0x3f   :  { %2858 = vmatpush1.bf16.msra.mxu1 %v2857_v27  ;;  %v2885_v19 = vpack.c.bf16 %v265_v18, %v263_v17  ;;  %v270_v21 = vld [vmem:[%s5532_s4 + $0x138] sm:$0xff]  ;;  %v267_v23 = vld [vmem:[%s5532_s4 + $0x120] sm:$0xff]  ;;  %v269_v24 = vld [vmem:[%s5532_s4 + $0x130] sm:$0xff] }
  0x40   :  { %2860 = vmatprep.subr.bf16.mxu1 %v2859_v28  ;;  %v2887_v22 = vpack.c.bf16 %v270_v21, %v268_v20  ;;  %v2889_v25 = vpack.c.bf16 %v269_v24, %v267_v23  ;;  %v272_v26 = vld [vmem:[%s5532_s4 + $0x148] sm:$0xff]  ;;  %v274_v27 = vld [vmem:[%s5532_s4 + $0x158] sm:$0xff]  ;;  %v271_v29 = vld [vmem:[%s5532_s4 + $0x140] sm:$0xff] }
  0x41   :  { %v2891_v28 = vpack.c.bf16 %v274_v27, %v272_v26  ;;  %v273_v30 = vld [vmem:[%s5532_s4 + $0x150] sm:$0xff]  ;;  %v276_v32 = vld [vmem:[%s5532_s4 + $0x168] sm:$0xff]  ;;  %v448_v41 = vld [vmem:[%s5539_s11] sm:$0xff] }
  0x42   :  { %v2893_v31 = vpack.c.bf16 %v273_v30, %v271_v29  ;;  %v277_v36 = vld [vmem:[%s5532_s4 + $0x170] sm:$0xff]  ;;  %v224_v38 = vld [vmem:[%s5531_s3 + $0x8] sm:$0xff]  ;;  %v452_v48 = vld [vmem:[%s5539_s11 + $0x20] sm:$0xff] }
  0x43   :  { %2862 = vmatpush1.bf16.msra.mxu1 %v2861_v33  ;;  %v278_v33 = vld [vmem:[%s5532_s4 + $0x178] sm:$0xff]  ;;  %v449_v42 = vld [vmem:[%s5539_s11 + $0x8] sm:$0xff]  ;;  %v450_v43 = vld [vmem:[%s5539_s11 + $0x10] sm:$0xff] }
  0x44   :  { %2864 = vmatprep.subr.bf16.mxu1 %v2863_v34  ;;  %v275_v34 = vld [vmem:[%s5532_s4 + $0x160] sm:$0xff]  ;;  %v2895_v35 = vpack.c.bf16 %v278_v33, %v276_v32  ;;  %v462_v6 = vld [vmem:[%s5539_s11 + $0x70] sm:$0xff] }
  0x45   :  { %v2897_v37 = vpack.c.bf16 %v277_v36, %v275_v34  ;;  %v460_v3 = vld [vmem:[%s5539_s11 + $0x60] sm:$0xff]  ;;  %v466_v12 = vld [vmem:[%s5539_s11 + $0x90] sm:$0xff] }
  0x46   :  { %v464_v9 = vld [vmem:[%s5539_s11 + $0x80] sm:$0xff]  ;;  %v225_v30 = vld [vmem:[%s5531_s3 + $0x10] sm:$0xff] }
  0x47   :  { %2866 = vmatpush1.bf16.msra.mxu1 %v2865_v39  ;;  %v226_v39 = vld [vmem:[%s5531_s3 + $0x18] sm:$0xff]  ;;  %v2625_v18 = vld [vmem:[%s5543_s15 + $0x1] ss:$8 sm:$0x3] }
  0x48   :  { %2868 = vmatprep.subr.bf16.mxu1 %v2867_v40  ;;  %v2899_v40 = vpack.c.bf16 %v226_v39, %v224_v38  ;;  %v201_v20 = vrot.slane %v2625_v18, %v3806_v54  ;;  %v197_v21 = vrot.slane %v2625_v18, %v3800_v52  ;;  %v223_v29 = vld [vmem:[%s5531_s3] sm:$0xff]  ;;  %v229_v38 = vld [vmem:[%s5531_s3 + $0x30] sm:$0xff]  ;;  %v661_v18 = vld [vmem:[%s5533_s5 + $0x38] sm:$0xff] }
  0x4b   :  { %2870 = vmatpush1.bf16.msra.mxu1 %v2869_v45  ;;  %v3907_v45 = vpack.c.bf16 %v449_v42, %v448_v41  ;;  %v468_v41 = vld [vmem:[%s5539_s11 + $0xa0] sm:$0xff]  ;;  %v469_v42 = vld [vmem:[%s5539_s11 + $0xa8] sm:$0xff] }
  0x4c   :  { %2872 = vmatprep.subr.bf16.mxu1 %v2871_v46  ;;  %v451_v46 = vld [vmem:[%s5539_s11 + $0x18] sm:$0xff] }
  0x4d   :  { %2909 = vmatpush1.bf16.msra.mxu0 %v3907_v45  ;;  %v3913_v47 = vpack.c.bf16 %v451_v46, %v450_v43  ;;  %v4050_v43 = vpack.c.bf16 %v469_v42, %v468_v41  ;;  %v470_v46 = vld [vmem:[%s5539_s11 + $0xb0] sm:$0xff]  ;;  %v670_v42 = vld [vmem:[%s5533_s5 + $0x80] sm:$0xff] }
  0x4e   :  { %2910 = vmatprep.subr.bf16.mxu0 %v3571_v44 }
  0x4f   :  { %2874 = vmatpush1.bf16.msra.mxu1 %v2873_v49  ;;  %v453_v49 = vld [vmem:[%s5539_s11 + $0x28] sm:$0xff] }
  0x50   :  { %2876 = vmatprep.subr.bf16.mxu1 %v2875_v4  ;;  %v3923_v53 = vpack.c.bf16 %v453_v49, %v452_v48  ;;  %v461_v4 = vld [vmem:[%s5539_s11 + $0x68] sm:$0xff]  ;;  %v471_v48 = vld [vmem:[%s5539_s11 + $0xb8] sm:$0xff] }
  0x51   :  { %2912 = vmatpush1.bf16.msra.mxu0 %v3913_v47  ;;  %v3963_v5 = vpack.c.bf16 %v461_v4, %v460_v3  ;;  %v4060_v49 = vpack.c.bf16 %v471_v48, %v470_v46  ;;  %v672_v46 = vld [vmem:[%s5533_s5 + $0x90] sm:$0xff]  ;;  %v675_v48 = vld [vmem:[%s5533_s5 + $0xa8] sm:$0xff] }
  0x52   :  { %2913 = vmatprep.subr.bf16.mxu0 %v3571_v44 }
  0x53   :  { %2878 = vmatpush1.bf16.msra.mxu1 %v2877_v7  ;;  %v463_v7 = vld [vmem:[%s5539_s11 + $0x78] sm:$0xff] }
  0x54   :  { %2880 = vmatprep.subr.bf16.mxu1 %v2879_v10  ;;  %v3973_v8 = vpack.c.bf16 %v463_v7, %v462_v6  ;;  %v465_v10 = vld [vmem:[%s5539_s11 + $0x88] sm:$0xff] }
  0x55   :  { %2915 = vmatpush1.bf16.msra.mxu0 %v3923_v53  ;;  %v3983_v11 = vpack.c.bf16 %v465_v10, %v464_v9  ;;  %v4085_v9 = vld [vmem:[%s5540_s12] sm:$0xff]  ;;  %v655_v10 = vld [vmem:[%s5533_s5 + $0x8] sm:$0xff] }
  0x56   :  { %2916 = vmatprep.subr.bf16.mxu0 %v3571_v44 }
  0x57   :  { %2882 = vmatpush1.bf16.msra.mxu1 %v2881_v13  ;;  %v467_v13 = vld [vmem:[%s5539_s11 + $0x98] sm:$0xff] }
  0x58   :  { %2884 = vmatprep.subr.bf16.mxu1 %v2883_v16  ;;  %v3993_v14 = vpack.c.bf16 %v467_v13, %v466_v12  ;;  %v657_v12 = vld [vmem:[%s5533_s5 + $0x18] sm:$0xff]  ;;  %v654_v13 = vld [vmem:[%s5533_s5] sm:$0xff] }
  0x5b   :  { %2886 = vmatpush1.bf16.msra.mxu1 %v2885_v19  ;;  %v2626_v19 = vld [vmem:[%s5543_s15 + $0x2] ss:$8 sm:$0x3] }
  0x5c   :  { %2888 = vmatprep.subr.bf16.mxu1 %v2887_v22  ;;  %v212_v26 = vrot.slane %v2626_v19, %v3800_v52 }
  0x5f   :  { %2890 = vmatpush1.bf16.msra.mxu1 %v2889_v25  ;;  %v216_v25 = vrot.slane %v2626_v19, %v3806_v54 }
  0x60   :  { %2892 = vmatprep.subr.bf16.mxu1 %v2891_v28 }
  0x63   :  { %2894 = vmatpush1.bf16.msra.mxu1 %v2893_v31 }
  0x64   :  { %2896 = vmatprep.subr.bf16.mxu1 %v2895_v35  ;;  %v2901_v35 = vpack.c.bf16 %v225_v30, %v223_v29  ;;  %v667_v29 = vld [vmem:[%s5533_s5 + $0x68] sm:$0xff]  ;;  %v669_v30 = vld [vmem:[%s5533_s5 + $0x78] sm:$0xff] }
  0x67   :  { %2898 = vmatpush1.bf16.msra.mxu1 %v2897_v37  ;;  %v227_v37 = vld [vmem:[%s5531_s3 + $0x20] sm:$0xff] }
  0x68   :  { %2900 = vmatprep.subr.bf16.mxu1 %v2899_v40  ;;  %v2905_v39 = vpack.c.bf16 %v229_v38, %v227_v37  ;;  %v4040_v40 = vld [vmem:[#allocation2] sm:$0xff]  ;;  %v671_v37 = vld [vmem:[%s5533_s5 + $0x88] sm:$0xff]  ;;  %v673_v38 = vld [vmem:[%s5533_s5 + $0x98] sm:$0xff] }
  0x69   :  { %v2959_v41 = vpack.c.bf16 %v673_v38, %v671_v37  ;;  %v692_v37 = vld [vmem:[%s5533_s5 + $0x130] sm:$0xff]  ;;  %v695_v38 = vld [vmem:[%s5533_s5 + $0x148] sm:$0xff] }
 0x10d   :  { %v174_v57 = vpop.f32.mrb[0].mxu1 }
 0x10e   :  { %v3810_v58 = vadd.f32 %v174_v57, %v97_v55  ;;  %v176_v59 = vpop.f32.mrb[1].mxu1  ;;  %v454_v55 = vld [vmem:[%s5539_s11 + $0x30] sm:$0xff] }
 0x10f   :  { %v3812_v60 = vadd.f32 %v176_v59, %v101_v56  ;;  %v455_v56 = vld [vmem:[%s5539_s11 + $0x38] sm:$0xff]  ;;  %v456_v59 = vld [vmem:[%s5539_s11 + $0x40] sm:$0xff] }
 0x110   :  { %v179_v62 = vmul.f32 %v3810_v58, %v3810_v58  ;;  %v3933_v57 = vpack.c.bf16 %v455_v56, %v454_v55  ;;  %v4066_v55 = vld [vmem:[%s5540_s12 + $0x8] sm:$0xff] }
 0x111   :  { %v180_v61 = vmul.f32 %v3812_v60, %v3812_v60  ;;  %v2629_v56 = vld [vmem:[%s5543_s15 + $0x3] ss:$8 sm:$0x3] }
 0x112   :  { %2918 = vmatpush1.bf16.msra.mxu0 %v3933_v57 }
 0x113   :  { %v182_v63 = vsel %vm181_vm1, %v180_v61, 0.0  ;;  %v457_v61 = vld [vmem:[%s5539_s11 + $0x48] sm:$0xff]  ;;  %2919 = vmatprep.subr.bf16.mxu0 %v3571_v44 }
 0x114   :  { %v183_v1 = vadd.f32 %v182_v63, %v179_v62  ;;  %v3943_v62 = vpack.c.bf16 %v457_v61, %v456_v59  ;;  %v458_v63 = vld [vmem:[%s5539_s11 + $0x50] sm:$0xff]  ;;  %v433_v59 = vrot.slane %v2629_v56, %v3800_v52  ;;  %v437_v61 = vrot.slane %v2629_v56, %v3806_v54  ;;  %v677_v56 = vld [vmem:[%s5533_s5 + $0xb8] sm:$0xff] }
 0x116   :  { %184 = vadd.xlane.f32.xlu0 %v183_v1  ;;  %v459_v1 = vld [vmem:[%s5539_s11 + $0x58] sm:$0xff]  ;;  %2921 = vmatpush1.bf16.msra.mxu0 %v3943_v62 }
 0x117   :  { %v3953_v2 = vpack.c.bf16 %v459_v1, %v458_v63  ;;  %2922 = vmatprep.subr.bf16.mxu0 %v3571_v44 }
 0x11a   :  { %2924 = vmatpush1.bf16.msra.mxu0 %v3953_v2 }
 0x11b   :  { %2925 = vmatprep.subr.bf16.mxu0 %v3571_v44 }
 0x11e   :  { %2927 = vmatpush1.bf16.msra.mxu0 %v3963_v5 }
 0x11f   :  { %2928 = vmatprep.subr.bf16.mxu0 %v3571_v44 }
 0x122   :  { %2930 = vmatpush1.bf16.msra.mxu0 %v3973_v8 }
 0x123   :  { %2931 = vmatprep.subr.bf16.mxu0 %v3571_v44 }
 0x126   :  { %2933 = vmatpush1.bf16.msra.mxu0 %v3983_v11 }
 0x127   :  { %2934 = vmatprep.subr.bf16.mxu0 %v3571_v44 }
 0x12a   :  { %2936 = vmatpush1.bf16.msra.mxu0 %v3993_v14 }
 0x12b   :  { %2937 = vmatprep.subr.bf16.mxu0 %v3571_v44 }
 0x12e   :  { %2939 = vmatpush1.bf16.msra.mxu0 %v4050_v43 }
 0x12f   :  { %2940 = vmatprep.subr.bf16.mxu0 %v3571_v44 }
 0x132   :  { %2942 = vmatpush1.bf16.msra.mxu0 %v4060_v49 }
 0x133   :  { %551 = vmatprep.subr.mxu0 %v4066_v55 }
 0x1a3   :  { %v185_v15 = vpop.xlane.xlu0 %184 }
 0x1a4   :  { %v186_v16 = vmul.f32 0.0052083335, %v185_v15  ;;  %v2943_v15 = vpack.c.bf16 %v657_v12, %v655_v10  ;;  %v679_v12 = vld [vmem:[%s5533_s5 + $0xc8] sm:$0xff] }
 0x1a6   :  { %v187_v17 = vadd.f32 1e-05, %v186_v16  ;;  %v656_v16 = vld [vmem:[%s5533_s5 + $0x10] sm:$0xff] }
 0x1a7   :  { %v2945_v19 = vpack.c.bf16 %v656_v16, %v654_v13  ;;  %v681_v13 = vld [vmem:[%s5533_s5 + $0xd8] sm:$0xff]  ;;  %v678_v16 = vld [vmem:[%s5533_s5 + $0xc0] sm:$0xff] }
 0x1a8   :  { %3470 = vrsqrt.f32 %v187_v17  ;;  %v659_v17 = vld [vmem:[%s5533_s5 + $0x28] sm:$0xff] }
 0x1b2   :  { %v3471_v22 = vpop.eup %3470 }
 0x1b3   :  { %v189_v23 = vmul.f32 %v3471_v22, %v3810_v58  ;;  %v190_v24 = vmul.f32 %v3471_v22, %v3812_v60  ;;  %v228_v58 = vld [vmem:[%s5531_s3 + $0x28] sm:$0xff]  ;;  %v230_v60 = vld [vmem:[%s5531_s3 + $0x38] sm:$0xff]  ;;  %v660_v22 = vld [vmem:[%s5533_s5 + $0x30] sm:$0xff] }
 0x1b4   :  { %v2903_v36 = vpack.c.bf16 %v230_v60, %v228_v58  ;;  %v2955_v60 = vpack.c.bf16 %v669_v30, %v667_v29  ;;  %v688_v29 = vld [vmem:[%s5533_s5 + $0x110] sm:$0xff]  ;;  %v691_v30 = vld [vmem:[%s5533_s5 + $0x128] sm:$0xff] }
 0x1b5   :  { %v205_v27 = vmul.f32 %v201_v20, %v190_v24  ;;  %v204_v28 = vmul.f32 %v197_v21, %v189_v23  ;;  %v2947_v20 = vpack.c.bf16 %v661_v18, %v659_v17  ;;  %v658_v21 = vld [vmem:[%s5533_s5 + $0x20] sm:$0xff]  ;;  %v663_v23 = vld [vmem:[%s5533_s5 + $0x48] sm:$0xff]  ;;  %v665_v24 = vld [vmem:[%s5533_s5 + $0x58] sm:$0xff] }
 0x1b6   :  { %v680_v17 = vld [vmem:[%s5533_s5 + $0xd0] sm:$0xff] }
 0x1b7   :  { %v4016_v31 = vadd.f32 %v216_v25, %v205_v27  ;;  %v4018_v32 = vadd.f32 %v212_v26, %v204_v28  ;;  %v2949_v25 = vpack.c.bf16 %v660_v22, %v658_v21  ;;  %v2951_v26 = vpack.c.bf16 %v665_v24, %v663_v23  ;;  %v662_v27 = vld [vmem:[%s5533_s5 + $0x40] sm:$0xff]  ;;  %v664_v28 = vld [vmem:[%s5533_s5 + $0x50] sm:$0xff] }
 0x1b8   :  { %v2953_v58 = vpack.c.bf16 %v664_v28, %v662_v27  ;;  %v2969_v18 = vpack.c.bf16 %v680_v17, %v678_v16  ;;  %v682_v22 = vld [vmem:[%s5533_s5 + $0xe0] sm:$0xff]  ;;  %v684_v23 = vld [vmem:[%s5533_s5 + $0xf0] sm:$0xff] }
 0x1b9   :  { %v222_v33 = vmax.f32 %v4016_v31, 0.0  ;;  %v221_v34 = vmax.f32 %v4018_v32, 0.0  ;;  %v2973_v24 = vpack.c.bf16 %v684_v23, %v682_v22  ;;  %v686_v27 = vld [vmem:[%s5533_s5 + $0x100] sm:$0xff]  ;;  %v1090_v31 = vld [vmem:[%s5536_s8 + $0x78] sm:$0xff]  ;;  %v988_v32 = vld [vmem:[%s5534_s6 + $0x70] sm:$0xff] }
 0x1ba   :  { %v2630_v16 = vld [vmem:[%s5543_s15 + $0x4] ss:$8 sm:$0x3]  ;;  %v2631_v17 = vld [vmem:[%s5543_s15 + $0x5] ss:$8 sm:$0x3] }
 0x1bb   :  { %2627 = vmatprep.mubr.msk.f32.mxu1 %vm181_vm1, %v222_v33  ;;  %v643_v23 = vrot.slane %v2631_v17, %v3800_v52 }
 0x1bc   :  { %347 = vmatmul.mubr.f32.vlgmr.msra.gmra.mrb[2].mxu1 %v221_v34 }
 0x1bd   :  { %2902 = vmatpush1.bf16.msra.mxu1 %v2901_v35  ;;  %420 = vmatprep.mubr.f32.mxu1 %v3570_v0  ;;  %v666_v35 = vld [vmem:[%s5533_s5 + $0x60] sm:$0xff] }
 0x1be   :  { %2904 = vmatprep.subr.bf16.mxu1 %v2903_v36  ;;  %v668_v36 = vld [vmem:[%s5533_s5 + $0x70] sm:$0xff] }
 0x1c1   :  { %2906 = vmatpush1.bf16.msra.mxu1 %v2905_v39  ;;  %v2957_v39 = vpack.c.bf16 %v668_v36, %v666_v35  ;;  %v690_v36 = vld [vmem:[%s5533_s5 + $0x120] sm:$0xff] }
 0x1c2   :  { %2944 = vmatprep.subr.bf16.mxu1 %v2943_v15  ;;  %v2967_v15 = vpack.c.bf16 %v681_v13, %v679_v12 }
 0x1c4   :  { %2628 = vmatmul.mubr.msk.f32.vlgmr.msra.gmra.mrb[2].mxu1 %vm104_vm0, %v4040_v40 }
 0x1c5   :  { %2946 = vmatpush1.bf16.msra.mxu1 %v2945_v19  ;;  %v683_v19 = vld [vmem:[%s5533_s5 + $0xe8] sm:$0xff] }
 0x1c6   :  { %2948 = vmatprep.subr.bf16.mxu1 %v2947_v20  ;;  %v685_v20 = vld [vmem:[%s5533_s5 + $0xf8] sm:$0xff] }
 0x1c7   :  { %v2971_v21 = vpack.c.bf16 %v685_v20, %v683_v19  ;;  %v634_v20 = vrot.slane %v2630_v16, %v3806_v54 }
 0x1c9   :  { %2950 = vmatpush1.bf16.msra.mxu1 %v2949_v25  ;;  %v687_v25 = vld [vmem:[%s5533_s5 + $0x108] sm:$0xff] }
 0x1ca   :  { %2952 = vmatprep.subr.bf16.mxu1 %v2951_v26  ;;  %v689_v26 = vld [vmem:[%s5533_s5 + $0x118] sm:$0xff] }
 0x1cb   :  { %v2975_v28 = vpack.c.bf16 %v689_v26, %v687_v25  ;;  %v647_v25 = vrot.slane %v2631_v17, %v3806_v54  ;;  %v982_v17 = vld [vmem:[%s5534_s6 + $0x40] sm:$0xff] }
 0x1cd   :  { %2954 = vmatpush1.bf16.msra.mxu1 %v2953_v58  ;;  %v693_v58 = vld [vmem:[%s5533_s5 + $0x138] sm:$0xff] }
 0x1ce   :  { %2956 = vmatprep.subr.bf16.mxu1 %v2955_v60  ;;  %v2977_v60 = vpack.c.bf16 %v688_v29, %v686_v27  ;;  %v2979_v35 = vpack.c.bf16 %v693_v58, %v691_v30 }
 0x1d1   :  { %2958 = vmatpush1.bf16.msra.mxu1 %v2957_v39  ;;  %v697_v39 = vld [vmem:[%s5533_s5 + $0x158] sm:$0xff] }
 0x1d2   :  { %2960 = vmatprep.subr.bf16.mxu1 %v2959_v41  ;;  %v2981_v41 = vpack.c.bf16 %v692_v37, %v690_v36 }
 0x297   :  { %v422_v63 = vpop.f32.mrb[2].mxu1 }
 0x298   :  { %v4074_v1 = vadd.f32 %v433_v59, %v422_v63  ;;  %v424_v3 = vpop.f32.mrb[3].mxu1  ;;  %v2961_v59 = vpack.c.bf16 %v672_v46, %v670_v42  ;;  %v674_v63 = vld [vmem:[%s5533_s5 + $0xa0] sm:$0xff]  ;;  %v2983_v42 = vpack.c.bf16 %v697_v39, %v695_v38 }
 0x299   :  { %v4076_v4 = vadd.f32 %v437_v61, %v424_v3  ;;  %v2963_v61 = vpack.c.bf16 %v677_v56, %v675_v48  ;;  %v676_v3 = vld [vmem:[%s5533_s5 + $0xb0] sm:$0xff]  ;;  %v694_v46 = vld [vmem:[%s5533_s5 + $0x140] sm:$0xff]  ;;  %v699_v56 = vld [vmem:[%s5533_s5 + $0x168] sm:$0xff] }
 0x29a   :  { %v446_v7 = vmul.f32 %v4074_v1, %v4074_v1  ;;  %2962 = vmatpush1.bf16.msra.mxu1 %v2961_v59  ;;  %v696_v48 = vld [vmem:[%s5533_s5 + $0x150] sm:$0xff]  ;;  %v701_v59 = vld [vmem:[%s5533_s5 + $0x178] sm:$0xff] }
 0x29b   :  { %v447_v6 = vmul.f32 %v4076_v4, %v4076_v4  ;;  %2964 = vmatprep.subr.bf16.mxu1 %v2963_v61  ;;  %v2985_v61 = vpack.c.bf16 %v696_v48, %v694_v46  ;;  %v1126_v46 = vld [vmem:[%s5535_s7 + $0x18] sm:$0xff] }
 0x29d   :  { %2632 = vmatprep.mubr.msk.f32.mxu0 %vm181_vm1, %v447_v6  ;;  %v2965_v6 = vpack.c.bf16 %v676_v3, %v674_v63  ;;  %v2987_v63 = vpack.c.bf16 %v701_v59, %v699_v56  ;;  %v698_v3 = vld [vmem:[%s5533_s5 + $0x160] sm:$0xff]  ;;  %v975_v59 = vld [vmem:[%s5534_s6 + $0x8] sm:$0xff] }
 0x29e   :  { %540 = vmatmul.mubr.f32.vlgmr.msra.gmra.mrb[0].mxu0 %v446_v7  ;;  %v974_v56 = vld [vmem:[%s5534_s6] sm:$0xff] }
 0x29f   :  { %552 = vmatpush1.msra.mxu0 %v4085_v9  ;;  %615 = vmatprep.mubr.f32.mxu0 %v3570_v0 }
 0x2a0   :  { %2991 = vmatprep.subr.bf16.mxu0 %v3571_v44  ;;  %2966 = vmatpush1.bf16.msra.mxu1 %v2965_v6  ;;  %v700_v6 = vld [vmem:[%s5533_s5 + $0x170] sm:$0xff] }
 0x2a1   :  { %2968 = vmatprep.subr.bf16.mxu1 %v2967_v15 }
 0x2a4   :  { %2970 = vmatpush1.bf16.msra.mxu1 %v2969_v18  ;;  %v630_v18 = vrot.slane %v2630_v16, %v3800_v52 }
 0x2a5   :  { %2972 = vmatprep.subr.bf16.mxu1 %v2971_v21 }
 0x2a8   :  { %2974 = vmatpush1.bf16.msra.mxu1 %v2973_v24 }
 0x2a9   :  { %2976 = vmatprep.subr.bf16.mxu1 %v2975_v28 }
 0x2ac   :  { %2978 = vmatpush1.bf16.msra.mxu1 %v2977_v60 }
 0x2ad   :  { %2980 = vmatprep.subr.bf16.mxu1 %v2979_v35 }
 0x2b0   :  { %2982 = vmatpush1.bf16.msra.mxu1 %v2981_v41 }
 0x2b1   :  { %2984 = vmatprep.subr.bf16.mxu1 %v2983_v42  ;;  %v1124_v42 = vld [vmem:[%s5535_s7 + $0x8] sm:$0xff] }
 0x2b2   :  { %v3063_v48 = vpack.c.bf16 %v1126_v46, %v1124_v42  ;;  %v1080_v42 = vld [vmem:[%s5536_s8 + $0x28] sm:$0xff]  ;;  %v1082_v46 = vld [vmem:[%s5536_s8 + $0x38] sm:$0xff] }
 0x2b4   :  { %2986 = vmatpush1.bf16.msra.mxu1 %v2985_v61  ;;  %v976_v61 = vld [vmem:[%s5534_s6 + $0x10] sm:$0xff] }
 0x2b5   :  { %2988 = vmatprep.subr.bf16.mxu1 %v2987_v63  ;;  %v3028_v63 = vpack.c.bf16 %v975_v59, %v974_v56  ;;  %v3075_v56 = vpack.c.bf16 %v1082_v46, %v1080_v42  ;;  %v1079_v59 = vld [vmem:[%s5536_s8 + $0x20] sm:$0xff]  ;;  %v1105_v46 = vld [vmem:[%s5536_s8 + $0xf0] sm:$0xff] }
 0x2b6   :  { %v1103_v42 = vld [vmem:[%s5536_s8 + $0xe0] sm:$0xff] }
 0x371   :  { %v541_v7 = vpop.f32.mrb[0].mxu0 }
 0x372   :  { %v543_v10 = vpop.f32.mrb[1].mxu0  ;;  %2633 = vmatmul.mubr.msk.f32.vlgmr.msra.gmra.mrb[2].mxu0 %vm547_vm2, %v541_v7  ;;  %v2989_v7 = vpack.c.bf16 %v700_v6, %v698_v3  ;;  %v977_v3 = vld [vmem:[%s5534_s6 + $0x18] sm:$0xff] }
 0x373   :  { %2993 = vmatpush1.bf16.msra.mxu0 %v3907_v45  ;;  %v3031_v6 = vpack.c.bf16 %v977_v3, %v976_v61  ;;  %v1081_v61 = vld [vmem:[%s5536_s8 + $0x30] sm:$0xff]  ;;  %v1086_v3 = vld [vmem:[%s5536_s8 + $0x58] sm:$0xff] }
 0x374   :  { %2994 = vmatprep.subr.bf16.mxu0 %v3571_v44  ;;  %2990 = vmatpush1.bf16.msra.mxu1 %v2989_v7  ;;  %v978_v7 = vld [vmem:[%s5534_s6 + $0x20] sm:$0xff] }
 0x375   :  { %871 = vmatprep.subr.mxu1 %v4066_v55 }
 0x377   :  { %2996 = vmatpush1.bf16.msra.mxu0 %v3913_v47 }
 0x378   :  { %2997 = vmatprep.subr.bf16.mxu0 %v3571_v44 }
 0x37b   :  { %2999 = vmatpush1.bf16.msra.mxu0 %v3923_v53 }
 0x37c   :  { %3000 = vmatprep.subr.bf16.mxu0 %v3571_v44 }
 0x37f   :  { %3002 = vmatpush1.bf16.msra.mxu0 %v3933_v57 }
 0x380   :  { %3003 = vmatprep.subr.bf16.mxu0 %v3571_v44 }
 0x383   :  { %3005 = vmatpush1.bf16.msra.mxu0 %v3943_v62 }
 0x384   :  { %3006 = vmatprep.subr.bf16.mxu0 %v3571_v44 }
 0x387   :  { %3008 = vmatpush1.bf16.msra.mxu0 %v3953_v2 }
 0x388   :  { %3009 = vmatprep.subr.bf16.mxu0 %v3571_v44 }
 0x38b   :  { %3011 = vmatpush1.bf16.msra.mxu0 %v3963_v5 }
 0x38c   :  { %3012 = vmatprep.subr.bf16.mxu0 %v3571_v44 }
 0x38f   :  { %3014 = vmatpush1.bf16.msra.mxu0 %v3973_v8 }
 0x390   :  { %3015 = vmatprep.subr.bf16.mxu0 %v3571_v44 }
 0x393   :  { %3017 = vmatpush1.bf16.msra.mxu0 %v3983_v11 }
 0x394   :  { %3018 = vmatprep.subr.bf16.mxu0 %v3571_v44 }
 0x397   :  { %3020 = vmatpush1.bf16.msra.mxu0 %v3993_v14 }
 0x398   :  { %3021 = vmatprep.subr.bf16.mxu0 %v3571_v44 }
 0x39b   :  { %3023 = vmatpush1.bf16.msra.mxu0 %v4050_v43 }
 0x39c   :  { %3024 = vmatprep.subr.bf16.mxu0 %v3571_v44 }
 0x39f   :  { %3026 = vmatpush1.bf16.msra.mxu0 %v4060_v49 }
 0x3a0   :  { %3027 = vmatprep.subr.bf16.mxu0 %v3571_v44 }
 0x445   :  { %v617_v10 = vpop.f32.mrb[2].mxu0 }
 0x446   :  { %v618_v12 = vadd.f32 1e-05, %v617_v10  ;;  %v619_v13 = vpop.f32.mrb[3].mxu0  ;;  %v979_v10 = vld [vmem:[%s5534_s6 + $0x28] sm:$0xff] }
 0x447   :  { %v620_v15 = vadd.f32 1e-05, %v619_v13  ;;  %v980_v13 = vld [vmem:[%s5534_s6 + $0x30] sm:$0xff] }
 0x448   :  { %3472 = vrsqrt.f32 %v618_v12  ;;  %v3034_v12 = vpack.c.bf16 %v979_v10, %v978_v7  ;;  %v1083_v10 = vld [vmem:[%s5536_s8 + $0x40] sm:$0xff] }
 0x449   :  { %3474 = vrsqrt.f32 %v620_v15  ;;  %v981_v15 = vld [vmem:[%s5534_s6 + $0x38] sm:$0xff] }
 0x44a   :  { %v3037_v16 = vpack.c.bf16 %v981_v15, %v980_v13  ;;  %v1087_v15 = vld [vmem:[%s5536_s8 + $0x60] sm:$0xff] }
 0x452   :  { %v3473_v19 = vpop.eup %3472 }
 0x453   :  { %v3475_v21 = vpop.eup %3474  ;;  %v624_v22 = vmul.f32 %v3473_v19, %v4074_v1  ;;  %v2634_v1 = vld [vmem:[%s5543_s15 + $0x6] ss:$8 sm:$0x3] }
 0x454   :  { %v625_v24 = vmul.f32 %v3475_v21, %v4076_v4  ;;  %v708_v4 = vrot.slane %v2634_v1, %v3800_v52  ;;  %v712_v60 = vrot.slane %v2634_v1, %v3806_v54  ;;  %v985_v21 = vld [vmem:[%s5534_s6 + $0x58] sm:$0xff]  ;;  %v1076_v1 = vld [vmem:[%s5536_s8 + $0x8] sm:$0xff] }
 0x455   :  { %v637_v26 = vmul.f32 %v630_v18, %v624_v22  ;;  %v983_v18 = vld [vmem:[%s5534_s6 + $0x48] sm:$0xff] }
 0x456   :  { %v638_v27 = vmul.f32 %v634_v20, %v625_v24  ;;  %v3040_v19 = vpack.c.bf16 %v983_v18, %v982_v17  ;;  %v984_v20 = vld [vmem:[%s5534_s6 + $0x50] sm:$0xff]  ;;  %v1092_v17 = vld [vmem:[%s5536_s8 + $0x88] sm:$0xff]  ;;  %v1094_v18 = vld [vmem:[%s5536_s8 + $0x98] sm:$0xff] }
 0x457   :  { %v650_v28 = vadd.f32 %v643_v23, %v637_v26  ;;  %v3043_v22 = vpack.c.bf16 %v985_v21, %v984_v20  ;;  %v1123_v23 = vld [vmem:[%s5535_s7] sm:$0xff]  ;;  %v1125_v24 = vld [vmem:[%s5535_s7 + $0x10] sm:$0xff]  ;;  %v1130_v26 = vld [vmem:[%s5535_s7 + $0x38] sm:$0xff]  ;;  %v3087_v20 = vpack.c.bf16 %v1094_v18, %v1092_v17 }
 0x458   :  { %v651_v29 = vadd.f32 %v647_v25, %v638_v27  ;;  %v1128_v25 = vld [vmem:[%s5535_s7 + $0x28] sm:$0xff]  ;;  %v3065_v27 = vpack.c.bf16 %v1125_v24, %v1123_v23  ;;  %v1091_v21 = vld [vmem:[%s5536_s8 + $0x80] sm:$0xff]  ;;  %v1098_v24 = vld [vmem:[%s5536_s8 + $0xb8] sm:$0xff] }
 0x459   :  { %v652_v58 = vmax.f32 %v650_v28, 0.0  ;;  %v3067_v28 = vpack.c.bf16 %v1130_v26, %v1128_v25  ;;  %v1096_v23 = vld [vmem:[%s5536_s8 + $0xa8] sm:$0xff]  ;;  %v1115_v17 = vld [vmem:[%s5536_s8 + $0x140] sm:$0xff]  ;;  %v1117_v18 = vld [vmem:[%s5536_s8 + $0x150] sm:$0xff] }
 0x45a   :  { %v653_v30 = vmax.f32 %v651_v29, 0.0  ;;  %v1127_v29 = vld [vmem:[%s5535_s7 + $0x20] sm:$0xff]  ;;  %v3091_v26 = vpack.c.bf16 %v1098_v24, %v1096_v23  ;;  %v1121_v24 = vld [vmem:[%s5536_s8 + $0x170] sm:$0xff] }
 0x45b   :  { %v1119_v23 = vld [vmem:[%s5536_s8 + $0x160] sm:$0xff] }
 0x45c   :  { %2635 = vmatprep.mubr.msk.f32.mxu1 %vm181_vm1, %v653_v30  ;;  %v1129_v30 = vld [vmem:[%s5535_s7 + $0x30] sm:$0xff] }
 0x45d   :  { %783 = vmatmul.mubr.f32.vlgmr.msra.gmra.mrb[4].mxu1 %v652_v58 }
 0x45e   :  { %872 = vmatpush1.msra.mxu1 %v4085_v9  ;;  %935 = vmatprep.mubr.f32.mxu1 %v3570_v0 }
 0x45f   :  { %3064 = vmatprep.subr.bf16.mxu1 %v3063_v48 }
 0x530   :  { %v784_v35 = vpop.f32.mrb[4].mxu1 }
 0x531   :  { %v4281_v36 = vadd.f32 %v784_v35, %v708_v4  ;;  %v786_v37 = vpop.f32.mrb[5].mxu1  ;;  %v1078_v4 = vld [vmem:[%s5536_s8 + $0x18] sm:$0xff]  ;;  %v3069_v35 = vpack.c.bf16 %v1129_v30, %v1127_v29  ;;  %v1100_v29 = vld [vmem:[%s5536_s8 + $0xc8] sm:$0xff] }
 0x532   :  { %v4283_v38 = vadd.f32 %v786_v37, %v712_v60  ;;  %v3071_v37 = vpack.c.bf16 %v1078_v4, %v1076_v1  ;;  %v1102_v30 = vld [vmem:[%s5536_s8 + $0xd8] sm:$0xff]  ;;  %v1099_v4 = vld [vmem:[%s5536_s8 + $0xc0] sm:$0xff] }
 0x533   :  { %v793_v41 = vmul.f32 %v4281_v36, %v4281_v36  ;;  %v3095_v1 = vpack.c.bf16 %v1102_v30, %v1100_v29  ;;  %v991_v29 = vld [vmem:[%s5534_s6 + $0x88] sm:$0xff] }
 0x534   :  { %v794_v39 = vmul.f32 %v4283_v38, %v4283_v38 }
 0x536   :  { %2638 = vmatprep.mubr.msk.f32.mxu0 %vm181_vm1, %v794_v39  ;;  %v1075_v39 = vld [vmem:[%s5536_s8] sm:$0xff] }
 0x537   :  { %863 = vmatmul.mubr.f32.vlgmr.msra.gmra.mrb[4].mxu0 %v793_v41  ;;  %v1077_v41 = vld [vmem:[%s5536_s8 + $0x10] sm:$0xff] }
 0x538   :  { %3029 = vmatpush1.bf16.msra.mxu0 %v3028_v63  ;;  %v3073_v48 = vpack.c.bf16 %v1077_v41, %v1075_v39  ;;  %v1084_v63 = vld [vmem:[%s5536_s8 + $0x48] sm:$0xff] }
 0x539   :  { %3030 = vmatprep.subr.bf16.mxu0 %v3571_v44  ;;  %v3079_v7 = vpack.c.bf16 %v1086_v3, %v1084_v63  ;;  %v1107_v63 = vld [vmem:[%s5536_s8 + $0x100] sm:$0xff]  ;;  %v1109_v3 = vld [vmem:[%s5536_s8 + $0x110] sm:$0xff] }
 0x53c   :  { %3032 = vmatpush1.bf16.msra.mxu0 %v3031_v6  ;;  %v3077_v6 = vpack.c.bf16 %v1081_v61, %v1079_v59  ;;  %v3101_v59 = vpack.c.bf16 %v1105_v46, %v1103_v42 }
 0x53d   :  { %3033 = vmatprep.subr.bf16.mxu0 %v3571_v44 }
 0x540   :  { %3035 = vmatpush1.bf16.msra.mxu0 %v3034_v12  ;;  %v1085_v12 = vld [vmem:[%s5536_s8 + $0x50] sm:$0xff] }
 0x541   :  { %3036 = vmatprep.subr.bf16.mxu0 %v3571_v44 }
 0x544   :  { %3038 = vmatpush1.bf16.msra.mxu0 %v3037_v16  ;;  %v1089_v16 = vld [vmem:[%s5536_s8 + $0x70] sm:$0xff] }
 0x545   :  { %3039 = vmatprep.subr.bf16.mxu0 %v3571_v44 }
 0x548   :  { %3041 = vmatpush1.bf16.msra.mxu0 %v3040_v19  ;;  %v3085_v19 = vpack.c.bf16 %v1089_v16, %v1087_v15 }
 0x549   :  { %3042 = vmatprep.subr.bf16.mxu0 %v3571_v44 }
 0x54c   :  { %3044 = vmatpush1.bf16.msra.mxu0 %v3043_v22  ;;  %v1093_v22 = vld [vmem:[%s5536_s8 + $0x90] sm:$0xff] }
 0x54d   :  { %3045 = vmatprep.subr.bf16.mxu0 %v3571_v44  ;;  %v3089_v25 = vpack.c.bf16 %v1093_v22, %v1091_v21  ;;  %v3113_v21 = vpack.c.bf16 %v1117_v18, %v1115_v17 }
 0x60a   :  { %v864_v58 = vpop.f32.mrb[4].mxu0 }
 0x60b   :  { %v866_v60 = vpop.f32.mrb[5].mxu0  ;;  %2639 = vmatmul.mubr.msk.f32.vlgmr.msra.gmra.mrb[6].mxu1 %vm547_vm2, %v864_v58 }
 0x60c   :  { %3066 = vmatpush1.bf16.msra.mxu1 %v3065_v27  ;;  %1195 = vmatprep.mubr.f32.mxu1 %v3570_v0  ;;  %v1095_v27 = vld [vmem:[%s5536_s8 + $0xa0] sm:$0xff]  ;;  %v1101_v60 = vld [vmem:[%s5536_s8 + $0xd0] sm:$0xff] }
 0x60d   :  { %3068 = vmatprep.subr.bf16.mxu1 %v3067_v28  ;;  %v1097_v28 = vld [vmem:[%s5536_s8 + $0xb0] sm:$0xff]  ;;  %v3097_v39 = vpack.c.bf16 %v1101_v60, %v1099_v4  ;;  %v994_v60 = vld [vmem:[%s5534_s6 + $0xa0] sm:$0xff] }
 0x60e   :  { %v3093_v58 = vpack.c.bf16 %v1097_v28, %v1095_v27  ;;  %v987_v27 = vld [vmem:[%s5534_s6 + $0x68] sm:$0xff] }
 0x610   :  { %3070 = vmatpush1.bf16.msra.mxu1 %v3069_v35  ;;  %v1104_v35 = vld [vmem:[%s5536_s8 + $0xe8] sm:$0xff] }
 0x611   :  { %3072 = vmatprep.subr.bf16.mxu1 %v3071_v37  ;;  %v1106_v37 = vld [vmem:[%s5536_s8 + $0xf8] sm:$0xff] }
 0x612   :  { %v3099_v41 = vpack.c.bf16 %v1106_v37, %v1104_v35  ;;  %v995_v35 = vld [vmem:[%s5534_s6 + $0xa8] sm:$0xff] }
 0x613   :  { %2641 = vmatmul.mubr.msk.f32.vlgmr.msra.gmra.mrb[8].mxu1 %vm104_vm0, %v4040_v40  ;;  %v1088_v40 = vld [vmem:[%s5536_s8 + $0x68] sm:$0xff]  ;;  %v3058_v37 = vpack.c.bf16 %v995_v35, %v994_v60 }
 0x614   :  { %3074 = vmatpush1.bf16.msra.mxu1 %v3073_v48  ;;  %2642 = vmatprep.mubr.msk.f32.mxu1 %vm181_vm1, %v222_v33  ;;  %v3081_v33 = vpack.c.bf16 %v1085_v12, %v1083_v10  ;;  %v3083_v13 = vpack.c.bf16 %v1090_v31, %v1088_v40  ;;  %v1108_v48 = vld [vmem:[%s5536_s8 + $0x108] sm:$0xff]  ;;  %v3105_v10 = vpack.c.bf16 %v1109_v3, %v1107_v63  ;;  %v1111_v40 = vld [vmem:[%s5536_s8 + $0x120] sm:$0xff]  ;;  %v1113_v31 = vld [vmem:[%s5536_s8 + $0x130] sm:$0xff] }
 0x615   :  { %3076 = vmatprep.subr.bf16.mxu1 %v3075_v56  ;;  %v1110_v56 = vld [vmem:[%s5536_s8 + $0x118] sm:$0xff]  ;;  %v3109_v15 = vpack.c.bf16 %v1113_v31, %v1111_v40 }
 0x616   :  { %v3103_v61 = vpack.c.bf16 %v1110_v56, %v1108_v48  ;;  %v2637_v63 = vld [vmem:[%s5543_s15 + $0x18] ss:$8 sm:$0x3] }
 0x617   :  { %v963_v40 = vrot.slane %v2637_v63, %v3800_v52 }
 0x618   :  { %3078 = vmatpush1.bf16.msra.mxu1 %v3077_v6  ;;  %v1112_v6 = vld [vmem:[%s5536_s8 + $0x128] sm:$0xff] }
 0x619   :  { %3080 = vmatprep.subr.bf16.mxu1 %v3079_v7  ;;  %v1114_v7 = vld [vmem:[%s5536_s8 + $0x138] sm:$0xff] }
 0x61a   :  { %v3107_v12 = vpack.c.bf16 %v1114_v7, %v1112_v6 }
 0x61c   :  { %3082 = vmatpush1.bf16.msra.mxu1 %v3081_v33  ;;  %v1116_v33 = vld [vmem:[%s5536_s8 + $0x148] sm:$0xff] }
 0x61d   :  { %3084 = vmatprep.subr.bf16.mxu1 %v3083_v13  ;;  %v1118_v13 = vld [vmem:[%s5536_s8 + $0x158] sm:$0xff] }
 0x61e   :  { %v3111_v16 = vpack.c.bf16 %v1118_v13, %v1116_v33  ;;  %v967_v33 = vrot.slane %v2637_v63, %v3806_v54  ;;  %v1512_v63 = vld [vmem:[%s5537_s9 + $0x68] sm:$0xff] }
 0x620   :  { %3086 = vmatpush1.bf16.msra.mxu1 %v3085_v19  ;;  %v1120_v19 = vld [vmem:[%s5536_s8 + $0x168] sm:$0xff] }
 0x621   :  { %3088 = vmatprep.subr.bf16.mxu1 %v3087_v20  ;;  %v1122_v20 = vld [vmem:[%s5536_s8 + $0x178] sm:$0xff] }
 0x622   :  { %v3115_v22 = vpack.c.bf16 %v1122_v20, %v1120_v19 }
 0x624   :  { %3090 = vmatpush1.bf16.msra.mxu1 %v3089_v25  ;;  %v3117_v25 = vpack.c.bf16 %v1121_v24, %v1119_v23  ;;  %v1513_v24 = vld [vmem:[%s5537_s9 + $0x70] sm:$0xff] }
 0x625   :  { %3092 = vmatprep.subr.bf16.mxu1 %v3091_v26  ;;  %v986_v26 = vld [vmem:[%s5534_s6 + $0x60] sm:$0xff] }
 0x626   :  { %v3046_v28 = vpack.c.bf16 %v987_v27, %v986_v26  ;;  %v1519_v27 = vld [vmem:[%s5537_s9 + $0xa0] sm:$0xff] }
 0x628   :  { %3094 = vmatpush1.bf16.msra.mxu1 %v3093_v58  ;;  %3047 = vmatpush1.bf16.msra.mxu0 %v3046_v28  ;;  %v992_v58 = vld [vmem:[%s5534_s6 + $0x90] sm:$0xff]  ;;  %v1522_v28 = vld [vmem:[%s5537_s9 + $0xb8] sm:$0xff] }
 0x629   :  { %3096 = vmatprep.subr.bf16.mxu1 %v3095_v1  ;;  %3048 = vmatprep.subr.bf16.mxu0 %v3571_v44  ;;  %v993_v1 = vld [vmem:[%s5534_s6 + $0x98] sm:$0xff] }
 0x62a   :  { %v3055_v4 = vpack.c.bf16 %v993_v1, %v992_v58  ;;  %v1071_v1 = vld [vmem:[%s5543_s15 + $0x1c] ss:$0 sm:$0xff] }
 0x62c   :  { %3098 = vmatpush1.bf16.msra.mxu1 %v3097_v39  ;;  %v996_v39 = vld [vmem:[%s5534_s6 + $0xb0] sm:$0xff] }
 0x62d   :  { %3100 = vmatprep.subr.bf16.mxu1 %v3099_v41  ;;  %v997_v41 = vld [vmem:[%s5534_s6 + $0xb8] sm:$0xff] }
 0x62e   :  { %v3061_v42 = vpack.c.bf16 %v997_v41, %v996_v39  ;;  %v1502_v39 = vld [vmem:[%s5537_s9 + $0x18] sm:$0xff] }
 0x62f   :  { %v1506_v41 = vld [vmem:[%s5537_s9 + $0x38] sm:$0xff] }
 0x630   :  { %3102 = vmatpush1.bf16.msra.mxu1 %v3101_v59 }
 0x631   :  { %3104 = vmatprep.subr.bf16.mxu1 %v3103_v61  ;;  %v2636_v61 = vld [vmem:[%s5543_s15 + $0x7] ss:$8 sm:$0x3] }
 0x632   :  { %v950_v3 = vrot.slane %v2636_v61, %v3800_v52  ;;  %v954_v7 = vrot.slane %v2636_v61, %v3806_v54 }
 0x634   :  { %3106 = vmatpush1.bf16.msra.mxu1 %v3105_v10 }
 0x635   :  { %3108 = vmatprep.subr.bf16.mxu1 %v3107_v12 }
 0x638   :  { %3110 = vmatpush1.bf16.msra.mxu1 %v3109_v15 }
 0x639   :  { %3112 = vmatprep.subr.bf16.mxu1 %v3111_v16 }
 0x63c   :  { %3114 = vmatpush1.bf16.msra.mxu1 %v3113_v21  ;;  %v1507_v21 = vld [vmem:[%s5537_s9 + $0x40] sm:$0xff] }
 0x63d   :  { %3116 = vmatprep.subr.bf16.mxu1 %v3115_v22  ;;  %v1510_v22 = vld [vmem:[%s5537_s9 + $0x58] sm:$0xff] }
 0x63e   :  { %v3207_v23 = vpack.c.bf16 %v1510_v22, %v1507_v21  ;;  %v1535_v22 = vld [vmem:[%s5537_s9 + $0x120] sm:$0xff] }
 0x640   :  { %3118 = vmatpush1.bf16.msra.mxu1 %v3117_v25  ;;  %v1516_v25 = vld [vmem:[%s5537_s9 + $0x88] sm:$0xff] }
 0x641   :  { %1396 = vmatprep.subr.mxu1 %v4066_v55  ;;  %v3210_v26 = vpack.c.bf16 %v1516_v25, %v1513_v24  ;;  %v1537_v24 = vld [vmem:[%s5537_s9 + $0x130] sm:$0xff] }
 0x643   :  { %1267 = vmatmul.mubr.f32.vlgmr.msra.gmra.mrb[8].mxu1 %v221_v34  ;;  %v989_v34 = vld [vmem:[%s5534_s6 + $0x78] sm:$0xff] }
 0x644   :  { %1397 = vmatpush1.msra.mxu1 %v4085_v9  ;;  %1460 = vmatprep.mubr.f32.mxu1 %v3570_v0  ;;  %v3049_v55 = vpack.c.bf16 %v989_v34, %v988_v32  ;;  %v990_v9 = vld [vmem:[%s5534_s6 + $0x80] sm:$0xff]  ;;  %v3213_v32 = vpack.c.bf16 %v1522_v28, %v1519_v27  ;;  %v1525_v34 = vld [vmem:[%s5537_s9 + $0xd0] sm:$0xff]  ;;  %v1542_v28 = vld [vmem:[%s5537_s9 + $0x158] sm:$0xff] }
 0x645   :  { %v3052_v30 = vpack.c.bf16 %v991_v29, %v990_v9  ;;  %v1531_v29 = vld [vmem:[%s5537_s9 + $0x100] sm:$0xff] }
 0x646   :  { %3050 = vmatpush1.bf16.msra.mxu0 %v3049_v55  ;;  %v1528_v55 = vld [vmem:[%s5537_s9 + $0xe8] sm:$0xff] }
 0x647   :  { %3051 = vmatprep.subr.bf16.mxu0 %v3571_v44  ;;  %v3216_v9 = vpack.c.bf16 %v1528_v55, %v1525_v34  ;;  %v1541_v55 = vld [vmem:[%s5537_s9 + $0x150] sm:$0xff] }
 0x64a   :  { %3053 = vmatpush1.bf16.msra.mxu0 %v3052_v30  ;;  %v1534_v30 = vld [vmem:[%s5537_s9 + $0x118] sm:$0xff] }
 0x64b   :  { %3054 = vmatprep.subr.bf16.mxu0 %v3571_v44  ;;  %v3219_v58 = vpack.c.bf16 %v1534_v30, %v1531_v29  ;;  %v1543_v29 = vld [vmem:[%s5537_s9 + $0x160] sm:$0xff] }
 0x64e   :  { %3056 = vmatpush1.bf16.msra.mxu0 %v3055_v4 }
 0x64f   :  { %3057 = vmatprep.subr.bf16.mxu0 %v3571_v44 }
 0x652   :  { %3059 = vmatpush1.bf16.msra.mxu0 %v3058_v37  ;;  %v1499_v37 = vld [vmem:[%s5537_s9] sm:$0xff] }
 0x653   :  { %3060 = vmatprep.subr.bf16.mxu0 %v3571_v44 }
 0x656   :  { %3062 = vmatpush1.bf16.msra.mxu0 %v3061_v42  ;;  %v1509_v42 = vld [vmem:[%s5537_s9 + $0x50] sm:$0xff] }
 0x657   :  { %3119 = vmatprep.subr.bf16.mxu0 %v3571_v44 }
 0x6de   :  { %v937_v46 = vpop.f32.mrb[6].mxu1 }
 0x6df   :  { %v938_v48 = vadd.f32 1e-05, %v937_v46  ;;  %v939_v56 = vpop.f32.mrb[7].mxu1  ;;  %v3157_v46 = vpack.c.bf16 %v1502_v39, %v1499_v37  ;;  %v1550_v39 = vld [vmem:[%s5537_s9 + $0x198] sm:$0xff] }
 0x6e0   :  { %v940_v59 = vadd.f32 1e-05, %v939_v56  ;;  %v1505_v56 = vld [vmem:[%s5537_s9 + $0x30] sm:$0xff] }
 0x6e1   :  { %3476 = vrsqrt.f32 %v938_v48  ;;  %v3159_v48 = vpack.c.bf16 %v1509_v42, %v1506_v41  ;;  %v1549_v41 = vld [vmem:[%s5537_s9 + $0x190] sm:$0xff]  ;;  %v1552_v42 = vld [vmem:[%s5537_s9 + $0x1a8] sm:$0xff] }
 0x6e2   :  { %3478 = vrsqrt.f32 %v940_v59  ;;  %v1508_v59 = vld [vmem:[%s5537_s9 + $0x48] sm:$0xff] }
 0x6eb   :  { %v3477_v6 = vpop.eup %3476 }
 0x6ec   :  { %v3479_v10 = vpop.eup %3478  ;;  %v944_v12 = vmul.f32 %v3477_v6, %v4281_v36 }
 0x6ed   :  { %v945_v31 = vmul.f32 %v3479_v10, %v4283_v38  ;;  %v1501_v38 = vld [vmem:[%s5537_s9 + $0x10] sm:$0xff] }
 0x6ee   :  { %v957_v13 = vmul.f32 %v950_v3, %v944_v12  ;;  %v1515_v3 = vld [vmem:[%s5537_s9 + $0x80] sm:$0xff] }
 0x6ef   :  { %v958_v15 = vmul.f32 %v954_v7, %v945_v31  ;;  %v3161_v7 = vpack.c.bf16 %v1508_v59, %v1505_v56  ;;  %v3163_v10 = vpack.c.bf16 %v1515_v3, %v1512_v63  ;;  %v1511_v12 = vld [vmem:[%s5537_s9 + $0x60] sm:$0xff]  ;;  %v1518_v31 = vld [vmem:[%s5537_s9 + $0x98] sm:$0xff]  ;;  %v1557_v59 = vld [vmem:[%s5537_s9 + $0x1d0] sm:$0xff] }
 0x6f0   :  { %v970_v16 = vadd.f32 %v963_v40, %v957_v13  ;;  %v1514_v40 = vld [vmem:[%s5537_s9 + $0x78] sm:$0xff]  ;;  %v1556_v3 = vld [vmem:[%s5537_s9 + $0x1c8] sm:$0xff] }
 0x6f1   :  { %v971_v17 = vadd.f32 %v967_v33, %v958_v15  ;;  %v1521_v33 = vld [vmem:[%s5537_s9 + $0xb0] sm:$0xff]  ;;  %v3165_v13 = vpack.c.bf16 %v1514_v40, %v1511_v12  ;;  %v1554_v56 = vld [vmem:[%s5537_s9 + $0x1b8] sm:$0xff]  ;;  %v1563_v12 = vld [vmem:[%s5537_s9 + $0x200] sm:$0xff] }
 0x6f2   :  { %v972_v19 = vmax.f32 %v970_v16, 0.0  ;;  %v3167_v15 = vpack.c.bf16 %v1521_v33, %v1518_v31  ;;  %v1517_v16 = vld [vmem:[%s5537_s9 + $0x90] sm:$0xff]  ;;  %v3191_v63 = vpack.c.bf16 %v1557_v59, %v1554_v56  ;;  %v1760_v56 = vld [vmem:[%s5541_s13 + $0xa0] sm:$0xff]  ;;  %v1761_v59 = vld [vmem:[%s5541_s13 + $0xa8] sm:$0xff] }
 0x6f3   :  { %v973_v18 = vmax.f32 %v971_v17, 0.0  ;;  %v1520_v17 = vld [vmem:[%s5537_s9 + $0xa8] sm:$0xff] }
 0x6f5   :  { %2640 = vmatprep.mubr.msk.f32.mxu0 %vm181_vm1, %v973_v18  ;;  %v1524_v18 = vld [vmem:[%s5537_s9 + $0xc8] sm:$0xff] }
 0x6f6   :  { %1066 = vmatmul.mubr.f32.vlgmr.msra.gmra.mrb[6].mxu0 %v972_v19  ;;  %v1527_v19 = vld [vmem:[%s5537_s9 + $0xe0] sm:$0xff] }
 0x6f7   :  { %3121 = vmatpush1.bf16.msra.mxu0 %v3907_v45  ;;  %v2643_v45 = vld [vmem:[%s5543_s15 + $0x19] ss:$8 sm:$0x3] }
 0x6f8   :  { %3122 = vmatprep.subr.bf16.mxu0 %v3571_v44 }
 0x6fb   :  { %3124 = vmatpush1.bf16.msra.mxu0 %v3913_v47  ;;  %v1283_v47 = vrot.slane %v2643_v45, %v3806_v54 }
 0x6fc   :  { %3125 = vmatprep.subr.bf16.mxu0 %v3571_v44 }
 0x6ff   :  { %3127 = vmatpush1.bf16.msra.mxu0 %v3923_v53 }
 0x700   :  { %3128 = vmatprep.subr.bf16.mxu0 %v3571_v44 }
 0x703   :  { %3130 = vmatpush1.bf16.msra.mxu0 %v3933_v57 }
 0x704   :  { %3131 = vmatprep.subr.bf16.mxu0 %v3571_v44 }
 0x707   :  { %3133 = vmatpush1.bf16.msra.mxu0 %v3943_v62 }
 0x708   :  { %3134 = vmatprep.subr.bf16.mxu0 %v3571_v44 }
 0x70b   :  { %3136 = vmatpush1.bf16.msra.mxu0 %v3953_v2 }
 0x70c   :  { %3137 = vmatprep.subr.bf16.mxu0 %v3571_v44 }
 0x70f   :  { %3139 = vmatpush1.bf16.msra.mxu0 %v3963_v5  ;;  %v1279_v5 = vrot.slane %v2643_v45, %v3800_v52  ;;  %v3169_v45 = vpack.c.bf16 %v1520_v17, %v1517_v16  ;;  %v1561_v16 = vld [vmem:[%s5537_s9 + $0x1f0] sm:$0xff]  ;;  %v1564_v17 = vld [vmem:[%s5537_s9 + $0x208] sm:$0xff] }
 0x710   :  { %3140 = vmatprep.subr.bf16.mxu0 %v3571_v44 }
 0x713   :  { %3142 = vmatpush1.bf16.msra.mxu0 %v3973_v8 }
 0x714   :  { %3143 = vmatprep.subr.bf16.mxu0 %v3571_v44 }
 0x716   :  { %v1268_v53 = vpop.f32.mrb[8].mxu1 }
 0x717   :  { %v1270_v57 = vpop.f32.mrb[9].mxu1  ;;  %3145 = vmatpush1.bf16.msra.mxu0 %v3983_v11  ;;  %v4598_v8 = vadd.f32 %v1279_v5, %v1268_v53  ;;  %v1523_v53 = vld [vmem:[%s5537_s9 + $0xc0] sm:$0xff]  ;;  %v1533_v5 = vld [vmem:[%s5537_s9 + $0x110] sm:$0xff] }
 0x718   :  { %v4588_v62 = vadd.f32 %v1283_v47, %v1270_v57  ;;  %3146 = vmatprep.subr.bf16.mxu0 %v3571_v44  ;;  %v3171_v47 = vpack.c.bf16 %v1527_v19, %v1524_v18  ;;  %v1526_v57 = vld [vmem:[%s5537_s9 + $0xd8] sm:$0xff]  ;;  %v1569_v19 = vld [vmem:[%s5537_s9 + $0x230] sm:$0xff] }
 0x719   :  { %v1292_v11 = vmul.f32 %v4598_v8, %v4598_v8  ;;  %v1566_v18 = vld [vmem:[%s5537_s9 + $0x218] sm:$0xff] }
 0x71a   :  { %v1293_v2 = vmul.f32 %v4588_v62, %v4588_v62 }
 0x71b   :  { %3148 = vmatpush1.bf16.msra.mxu0 %v3993_v14  ;;  %v1500_v14 = vld [vmem:[%s5537_s9 + $0x8] sm:$0xff] }
 0x71c   :  { %2646 = vmatprep.mubr.msk.f32.mxu0 %vm181_vm1, %v1293_v2  ;;  %3149 = vmatprep.subr.bf16.mxu0 %v3571_v44  ;;  %v1530_v2 = vld [vmem:[%s5537_s9 + $0xf8] sm:$0xff] }
 0x71f   :  { %3151 = vmatpush1.bf16.msra.mxu0 %v4050_v43  ;;  %v1503_v43 = vld [vmem:[%s5537_s9 + $0x20] sm:$0xff] }
 0x720   :  { %3152 = vmatprep.subr.bf16.mxu0 %v3571_v44  ;;  %v3155_v36 = vpack.c.bf16 %v1503_v43, %v1500_v14  ;;  %v3175_v14 = vpack.c.bf16 %v1533_v5, %v1530_v2  ;;  %v1529_v43 = vld [vmem:[%s5537_s9 + $0xf0] sm:$0xff]  ;;  %v1568_v2 = vld [vmem:[%s5537_s9 + $0x228] sm:$0xff]  ;;  %v1567_v5 = vld [vmem:[%s5537_s9 + $0x220] sm:$0xff] }
 0x722   :  { %3156 = vmatprep.subr.bf16.mxu1 %v3155_v36  ;;  %v1532_v36 = vld [vmem:[%s5537_s9 + $0x108] sm:$0xff] }
 0x723   :  { %3154 = vmatpush1.bf16.msra.mxu0 %v4060_v49  ;;  %v1504_v49 = vld [vmem:[%s5537_s9 + $0x28] sm:$0xff] }
 0x724   :  { %3203 = vmatprep.subr.bf16.mxu0 %v3571_v44  ;;  %v3204_v20 = vpack.c.bf16 %v1504_v49, %v1501_v38  ;;  %v3177_v38 = vpack.c.bf16 %v1532_v36, %v1529_v43  ;;  %v1536_v49 = vld [vmem:[%s5537_s9 + $0x128] sm:$0xff]  ;;  %v1756_v36 = vld [vmem:[%s5541_s13 + $0x80] sm:$0xff] }
 0x726   :  { %1386 = vmatmul.mubr.f32.vlgmr.msra.gmra.mrb[8].mxu0 %v1292_v11  ;;  %v3173_v11 = vpack.c.bf16 %v1526_v57, %v1523_v53  ;;  %v3199_v53 = vpack.c.bf16 %v1569_v19, %v1566_v18  ;;  %v1565_v57 = vld [vmem:[%s5537_s9 + $0x210] sm:$0xff]  ;;  %v1748_v18 = vld [vmem:[%s5541_s13 + $0x40] sm:$0xff]  ;;  %v1749_v19 = vld [vmem:[%s5541_s13 + $0x48] sm:$0xff] }
 0x727   :  { %3205 = vmatpush1.bf16.msra.mxu0 %v3204_v20  ;;  %v1539_v20 = vld [vmem:[%s5537_s9 + $0x140] sm:$0xff] }
 0x728   :  { %3206 = vmatprep.subr.bf16.mxu0 %v3571_v44  ;;  %v3179_v21 = vpack.c.bf16 %v1539_v20, %v1536_v49 }
 0x72b   :  { %3208 = vmatpush1.bf16.msra.mxu0 %v3207_v23  ;;  %v1538_v23 = vld [vmem:[%s5537_s9 + $0x138] sm:$0xff] }
 0x72c   :  { %3209 = vmatprep.subr.bf16.mxu0 %v3571_v44  ;;  %v3181_v25 = vpack.c.bf16 %v1538_v23, %v1535_v22 }
 0x72f   :  { %3211 = vmatpush1.bf16.msra.mxu0 %v3210_v26  ;;  %v1540_v26 = vld [vmem:[%s5537_s9 + $0x148] sm:$0xff] }
 0x730   :  { %3212 = vmatprep.subr.bf16.mxu0 %v3571_v44  ;;  %v3222_v27 = vpack.c.bf16 %v1540_v26, %v1537_v24  ;;  %v2644_v24 = vld [vmem:[%s5543_s15 + $0x1a] ss:$8 sm:$0x3] }
 0x731   :  { %v1475_v26 = vrot.slane %v2644_v24, %v3800_v52 }
 0x733   :  { %3214 = vmatpush1.bf16.msra.mxu0 %v3213_v32  ;;  %v1545_v32 = vld [vmem:[%s5537_s9 + $0x170] sm:$0xff] }
 0x734   :  { %3215 = vmatprep.subr.bf16.mxu0 %v3571_v44  ;;  %v3183_v34 = vpack.c.bf16 %v1545_v32, %v1542_v28  ;;  %v1479_v28 = vrot.slane %v2644_v24, %v3806_v54  ;;  %v1754_v24 = vld [vmem:[%s5541_s13 + $0x70] sm:$0xff] }
 0x737   :  { %3217 = vmatpush1.bf16.msra.mxu0 %v3216_v9  ;;  %v1544_v9 = vld [vmem:[%s5537_s9 + $0x168] sm:$0xff] }
 0x738   :  { %3218 = vmatprep.subr.bf16.mxu0 %v3571_v44  ;;  %v3185_v30 = vpack.c.bf16 %v1544_v9, %v1541_v55 }
 0x73b   :  { %3220 = vmatpush1.bf16.msra.mxu0 %v3219_v58  ;;  %v1546_v58 = vld [vmem:[%s5537_s9 + $0x178] sm:$0xff] }
 0x73c   :  { %3221 = vmatprep.subr.bf16.mxu0 %v3571_v44 }
 0x73f   :  { %3223 = vmatpush1.bf16.msra.mxu0 %v3222_v27 }
 0x740   :  { %3224 = vmatprep.subr.bf16.mxu0 %v3571_v44 }
 0x7c9   :  { %v1067_v4 = vpop.f32.mrb[6].mxu0 }
 0x7ca   :  { %v1072_v60 = vadd.f32 %v1071_v1, %v1067_v4  ;;  %v1069_v35 = vpop.f32.mrb[7].mxu0  ;;  %v3225_v1 = vpack.c.bf16 %v1546_v58, %v1543_v29  ;;  %v1548_v4 = vld [vmem:[%s5537_s9 + $0x188] sm:$0xff] }
 0x7cb   :  { %v1547_v35 = vld [vmem:[%s5537_s9 + $0x180] sm:$0xff] }
 0x7cc   :  { %1074 = vst.msk [vmem:[#allocation7] sm:$0xff] %vm1073_vm3, %v1072_v60  ;;  %v1551_v60 = vld [vmem:[%s5537_s9 + $0x1a0] sm:$0xff]  ;;  %3226 = vmatpush1.bf16.msra.mxu0 %v3225_v1 }
 0x7cd   :  { %v3187_v37 = vpack.c.bf16 %v1551_v60, %v1548_v4  ;;  %3227 = vmatprep.subr.bf16.mxu0 %v3571_v44  ;;  %v1740_v4 = vld [vmem:[%s5541_s13] sm:$0xff]  ;;  %v1741_v60 = vld [vmem:[%s5541_s13 + $0x8] sm:$0xff] }
 0x7f9   :  { %v1387_v61 = vpop.f32.mrb[8].mxu0 }
 0x7fa   :  { %v1389_v6 = vpop.f32.mrb[9].mxu0  ;;  %2647 = vmatmul.mubr.msk.f32.vlgmr.msra.gmra.mrb[10].mxu1 %vm547_vm2, %v1387_v61  ;;  %v1553_v61 = vld [vmem:[%s5537_s9 + $0x1b0] sm:$0xff] }
 0x7fb   :  { %3158 = vmatpush1.bf16.msra.mxu1 %v3157_v46  ;;  %v3189_v46 = vpack.c.bf16 %v1550_v39, %v1547_v35  ;;  %v1555_v6 = vld [vmem:[%s5537_s9 + $0x1c0] sm:$0xff]  ;;  %v3193_v40 = vpack.c.bf16 %v1556_v3, %v1553_v61  ;;  %v3241_v39 = vpack.c.bf16 %v1741_v60, %v1740_v4 }
 0x7fc   :  { %3160 = vmatprep.subr.bf16.mxu1 %v3159_v48  ;;  %v3228_v48 = vpack.c.bf16 %v1552_v42, %v1549_v41  ;;  %v1744_v3 = vld [vmem:[%s5541_s13 + $0x20] sm:$0xff] }
 0x7fe   :  { %3229 = vmatpush1.bf16.msra.mxu0 %v3228_v48  ;;  %v1743_v48 = vld [vmem:[%s5541_s13 + $0x18] sm:$0xff] }
 0x7ff   :  { %3162 = vmatpush1.bf16.msra.mxu1 %v3161_v7  ;;  %v1558_v7 = vld [vmem:[%s5537_s9 + $0x1d8] sm:$0xff]  ;;  %3230 = vmatprep.subr.bf16.mxu0 %v3571_v44 }
 0x800   :  { %3164 = vmatprep.subr.bf16.mxu1 %v3163_v10  ;;  %v1560_v10 = vld [vmem:[%s5537_s9 + $0x1e8] sm:$0xff]  ;;  %v3231_v31 = vpack.c.bf16 %v1558_v7, %v1555_v6  ;;  %v1762_v7 = vld [vmem:[%s5541_s13 + $0xb0] sm:$0xff] }
 0x801   :  { %v3195_v33 = vpack.c.bf16 %v1563_v12, %v1560_v10  ;;  %v1745_v6 = vld [vmem:[%s5541_s13 + $0x28] sm:$0xff]  ;;  %v1763_v10 = vld [vmem:[%s5541_s13 + $0xb8] sm:$0xff] }
 0x802   :  { %3232 = vmatpush1.bf16.msra.mxu0 %v3231_v31  ;;  %v3249_v12 = vpack.c.bf16 %v1745_v6, %v1744_v3  ;;  %v1746_v31 = vld [vmem:[%s5541_s13 + $0x30] sm:$0xff] }
 0x803   :  { %3166 = vmatpush1.bf16.msra.mxu1 %v3165_v13  ;;  %v1559_v13 = vld [vmem:[%s5537_s9 + $0x1e0] sm:$0xff]  ;;  %3233 = vmatprep.subr.bf16.mxu0 %v3571_v44  ;;  %v1782_v6 = vld [vmem:[%s5541_s13 + $0x150] sm:$0xff] }
 0x804   :  { %3168 = vmatprep.subr.bf16.mxu1 %v3167_v15  ;;  %v1562_v15 = vld [vmem:[%s5537_s9 + $0x1f8] sm:$0xff] }
 0x807   :  { %3170 = vmatpush1.bf16.msra.mxu1 %v3169_v45  ;;  %v3197_v45 = vpack.c.bf16 %v1562_v15, %v1559_v13  ;;  %v1764_v13 = vld [vmem:[%s5541_s13 + $0xc0] sm:$0xff]  ;;  %v1765_v15 = vld [vmem:[%s5541_s13 + $0xc8] sm:$0xff] }
 0x808   :  { %3172 = vmatprep.subr.bf16.mxu1 %v3171_v47  ;;  %v3234_v47 = vpack.c.bf16 %v1564_v17, %v1561_v16  ;;  %v3255_v17 = vpack.c.bf16 %v1765_v15, %v1764_v13  ;;  %v1787_v15 = vld [vmem:[%s5541_s13 + $0x178] sm:$0xff] }
 0x80a   :  { %3235 = vmatpush1.bf16.msra.mxu0 %v3234_v47  ;;  %v1767_v47 = vld [vmem:[%s5541_s13 + $0xd8] sm:$0xff] }
 0x80b   :  { %3174 = vmatpush1.bf16.msra.mxu1 %v3173_v11  ;;  %v1570_v11 = vld [vmem:[%s5537_s9 + $0x238] sm:$0xff]  ;;  %3236 = vmatprep.subr.bf16.mxu0 %v3571_v44 }
 0x80c   :  { %3176 = vmatprep.subr.bf16.mxu1 %v3175_v14  ;;  %v3201_v14 = vpack.c.bf16 %v1568_v2, %v1565_v57  ;;  %v3237_v43 = vpack.c.bf16 %v1570_v11, %v1567_v5  ;;  %v1750_v2 = vld [vmem:[%s5541_s13 + $0x50] sm:$0xff]  ;;  %v1751_v5 = vld [vmem:[%s5541_s13 + $0x58] sm:$0xff]  ;;  %v1768_v11 = vld [vmem:[%s5541_s13 + $0xe0] sm:$0xff] }
 0x80e   :  { %3238 = vmatpush1.bf16.msra.mxu0 %v3237_v43  ;;  %v3261_v43 = vpack.c.bf16 %v1751_v5, %v1750_v2  ;;  %v2176_v5 = vld [vmem:[%s5538_s10 + $0x190] sm:$0xff] }
 0x80f   :  { %3178 = vmatpush1.bf16.msra.mxu1 %v3177_v38  ;;  %v1757_v38 = vld [vmem:[%s5541_s13 + $0x88] sm:$0xff] }
 0x810   :  { %3180 = vmatprep.subr.bf16.mxu1 %v3179_v21  ;;  %v3239_v49 = vpack.c.bf16 %v1757_v38, %v1756_v36  ;;  %v1752_v38 = vld [vmem:[%s5541_s13 + $0x60] sm:$0xff] }
 0x813   :  { %3182 = vmatpush1.bf16.msra.mxu1 %v3181_v25  ;;  %v2645_v25 = vld [vmem:[%s5543_s15 + $0x1b] ss:$8 sm:$0x3] }
 0x814   :  { %3184 = vmatprep.subr.bf16.mxu1 %v3183_v34  ;;  %v1488_v55 = vrot.slane %v2645_v25, %v3800_v52  ;;  %v1492_v29 = vrot.slane %v2645_v25, %v3806_v54  ;;  %v1755_v25 = vld [vmem:[%s5541_s13 + $0x78] sm:$0xff] }
 0x817   :  { %3186 = vmatpush1.bf16.msra.mxu1 %v3185_v30 }
 0x818   :  { %3188 = vmatprep.subr.bf16.mxu1 %v3187_v37 }
 0x81b   :  { %3190 = vmatpush1.bf16.msra.mxu1 %v3189_v46  ;;  %v1742_v46 = vld [vmem:[%s5541_s13 + $0x10] sm:$0xff] }
 0x81c   :  { %3192 = vmatprep.subr.bf16.mxu1 %v3191_v63  ;;  %v3245_v61 = vpack.c.bf16 %v1743_v48, %v1742_v46  ;;  %v3247_v63 = vpack.c.bf16 %v1761_v59, %v1760_v56  ;;  %v1778_v48 = vld [vmem:[%s5541_s13 + $0x130] sm:$0xff]  ;;  %v1779_v56 = vld [vmem:[%s5541_s13 + $0x138] sm:$0xff] }
 0x81d   :  { %v3281_v59 = vpack.c.bf16 %v1779_v56, %v1778_v48  ;;  %v2132_v56 = vld [vmem:[%s5538_s10 + $0x30] sm:$0xff] }
 0x81f   :  { %3194 = vmatpush1.bf16.msra.mxu1 %v3193_v40  ;;  %v3251_v40 = vpack.c.bf16 %v1763_v10, %v1762_v7  ;;  %v1783_v7 = vld [vmem:[%s5541_s13 + $0x158] sm:$0xff] }
 0x820   :  { %3196 = vmatprep.subr.bf16.mxu1 %v3195_v33  ;;  %v1747_v33 = vld [vmem:[%s5541_s13 + $0x38] sm:$0xff]  ;;  %v3287_v10 = vpack.c.bf16 %v1783_v7, %v1782_v6  ;;  %v2138_v7 = vld [vmem:[%s5538_s10 + $0x60] sm:$0xff] }
 0x821   :  { %v3253_v16 = vpack.c.bf16 %v1747_v33, %v1746_v31  ;;  %v1785_v31 = vld [vmem:[%s5541_s13 + $0x168] sm:$0xff] }
 0x823   :  { %3198 = vmatpush1.bf16.msra.mxu1 %v3197_v45  ;;  %v1766_v45 = vld [vmem:[%s5541_s13 + $0xd0] sm:$0xff] }
 0x824   :  { %3200 = vmatprep.subr.bf16.mxu1 %v3199_v53  ;;  %v3257_v53 = vpack.c.bf16 %v1749_v19, %v1748_v18  ;;  %v3259_v57 = vpack.c.bf16 %v1767_v47, %v1766_v45  ;;  %v1929_v19 = vld [vmem:[#allocation5 + $0x8] sm:$0xff]  ;;  %v1932_v45 = vld [vmem:[#allocation5 + $0x20] sm:$0xff] }
 0x825   :  { %v1928_v47 = vld [vmem:[#allocation5] sm:$0xff] }
 0x827   :  { %3202 = vmatpush1.bf16.msra.mxu1 %v3201_v14  ;;  %v1769_v14 = vld [vmem:[%s5541_s13 + $0xe8] sm:$0xff] }
 0x828   :  { %3240 = vmatprep.subr.bf16.mxu1 %v3239_v49  ;;  %v3263_v36 = vpack.c.bf16 %v1769_v14, %v1768_v11  ;;  %v1753_v49 = vld [vmem:[%s5541_s13 + $0x68] sm:$0xff] }
 0x829   :  { %v2179_v11 = vld [vmem:[%s5538_s10 + $0x1a8] sm:$0xff] }
 0x82a   :  { %v3398_v14 = vpack.c.bf16 %v2179_v11, %v2176_v5 }
 0x8cd   :  { %v1462_v20 = vpop.f32.mrb[10].mxu1 }
 0x8ce   :  { %v1463_v21 = vadd.f32 1e-05, %v1462_v20  ;;  %v1464_v22 = vpop.f32.mrb[11].mxu1  ;;  %v3265_v20 = vpack.c.bf16 %v1753_v49, %v1752_v38  ;;  %v2182_v49 = vld [vmem:[%s5538_s10 + $0x1c0] sm:$0xff] }
 0x8cf   :  { %v1465_v23 = vadd.f32 1e-05, %v1464_v22  ;;  %v1771_v22 = vld [vmem:[%s5541_s13 + $0xf8] sm:$0xff] }
 0x8d0   :  { %3480 = vrsqrt.f32 %v1463_v21  ;;  %v1770_v21 = vld [vmem:[%s5541_s13 + $0xf0] sm:$0xff] }
 0x8d1   :  { %3482 = vrsqrt.f32 %v1465_v23  ;;  %v3267_v23 = vpack.c.bf16 %v1771_v22, %v1770_v21  ;;  %v2134_v22 = vld [vmem:[%s5538_s10 + $0x40] sm:$0xff] }
 0x8da   :  { %v3481_v27 = vpop.eup %3480 }
 0x8db   :  { %v3483_v32 = vpop.eup %3482  ;;  %v1469_v34 = vmul.f32 %v3481_v27, %v4598_v8  ;;  %v1758_v8 = vld [vmem:[%s5541_s13 + $0x90] sm:$0xff]  ;;  %v2648_v27 = vld [vmem:[%s5543_s15 + $0x1d] ss:$8 sm:$0x7] }
 0x8dc   :  { %v1470_v9 = vmul.f32 %v3483_v32, %v4588_v62  ;;  %v1759_v62 = vld [vmem:[%s5541_s13 + $0x98] sm:$0xff]  ;;  %v1581_v32 = vrot.slane %v2648_v27, %v3806_v54 }
 0x8dd   :  { %v1482_v30 = vmul.f32 %v1475_v26, %v1469_v34  ;;  %v3243_v42 = vpack.c.bf16 %v1759_v62, %v1758_v8  ;;  %v3269_v26 = vpack.c.bf16 %v1755_v25, %v1754_v24  ;;  %v1774_v62 = vld [vmem:[%s5541_s13 + $0x110] sm:$0xff] }
 0x8de   :  { %v1483_v58 = vmul.f32 %v1479_v28, %v1470_v9  ;;  %v1577_v28 = vrot.slane %v2648_v27, %v3800_v52  ;;  %v2188_v25 = vld [vmem:[%s5538_s10 + $0x1f0] sm:$0xff] }
 0x8df   :  { %v1495_v1 = vadd.f32 %v1488_v55, %v1482_v30 }
 0x8e0   :  { %v1496_v35 = vadd.f32 %v1492_v29, %v1483_v58  ;;  %v1772_v58 = vld [vmem:[%s5541_s13 + $0x100] sm:$0xff] }
 0x8e1   :  { %v1497_v41 = vmax.f32 %v1495_v1, 0.0  ;;  %v1773_v1 = vld [vmem:[%s5541_s13 + $0x108] sm:$0xff] }
 0x8e2   :  { %v1498_v37 = vmax.f32 %v1496_v35, 0.0  ;;  %v3272_v35 = vpack.c.bf16 %v1773_v1, %v1772_v58  ;;  %v2130_v58 = vld [vmem:[%s5538_s10 + $0x20] sm:$0xff] }
 0x8e4   :  { %2649 = vmatprep.mubr.msk.f32.mxu1 %vm181_vm1, %v1498_v37  ;;  %2650 = vmatprep.mubr.msk.f32.mxu0 %vm181_vm1, %v1498_v37  ;;  %v1775_v37 = vld [vmem:[%s5541_s13 + $0x118] sm:$0xff] }
 0x8e5   :  { %1657 = vmatmul.mubr.f32.vlgmr.msra.gmra.mrb[12].mxu1 %v1497_v41  ;;  %1728 = vmatmul.mubr.f32.vlgmr.msra.gmra.mrb[10].mxu0 %v1497_v41  ;;  %v1776_v41 = vld [vmem:[%s5541_s13 + $0x120] sm:$0xff] }
 0x8e6   :  { %3242 = vmatpush3.bf16.msra.mxu1 %v3241_v39  ;;  %2002 = vmatprep.mubr.f32.mxu0 %v3570_v0  ;;  %v3275_v39 = vpack.c.bf16 %v1775_v37, %v1774_v62  ;;  %v2126_v37 = vld [vmem:[%s5538_s10] sm:$0xff] }
 0x8e7   :  { %3244 = vmatprep.subr.bf16.mxu1 %v3243_v42  ;;  %v1777_v42 = vld [vmem:[%s5541_s13 + $0x128] sm:$0xff] }
 0x8e8   :  { %v3278_v46 = vpack.c.bf16 %v1777_v42, %v1776_v41  ;;  %v2133_v41 = vld [vmem:[%s5538_s10 + $0x38] sm:$0xff]  ;;  %v2136_v42 = vld [vmem:[%s5538_s10 + $0x50] sm:$0xff] }
 0x8e9   :  { %v3306_v48 = vpack.c.bf16 %v2136_v42, %v2133_v41  ;;  %v2190_v41 = vld [vmem:[%s5538_s10 + $0x200] sm:$0xff] }
 0x8ea   :  { %3246 = vmatpush3.bf16.msra.mxu1 %v3245_v61  ;;  %v1780_v61 = vld [vmem:[%s5541_s13 + $0x140] sm:$0xff] }
 0x8eb   :  { %3248 = vmatprep.subr.bf16.mxu1 %v3247_v63  ;;  %v1781_v63 = vld [vmem:[%s5541_s13 + $0x148] sm:$0xff] }
 0x8ec   :  { %v3284_v3 = vpack.c.bf16 %v1781_v63, %v1780_v61  ;;  %v2139_v61 = vld [vmem:[%s5538_s10 + $0x68] sm:$0xff]  ;;  %v2142_v63 = vld [vmem:[%s5538_s10 + $0x80] sm:$0xff] }
 0x8ed   :  { %v3310_v6 = vpack.c.bf16 %v2142_v63, %v2139_v61  ;;  %v2143_v63 = vld [vmem:[%s5538_s10 + $0x88] sm:$0xff] }
 0x8ee   :  { %3250 = vmatpush3.bf16.msra.mxu1 %v3249_v12  ;;  %v5004_v12 = vsub.s32 2, %v3797_v51  ;;  %v1786_v51 = vld [vmem:[%s5541_s13 + $0x170] sm:$0xff] }
 0x8ef   :  { %3252 = vmatprep.subr.bf16.mxu1 %v3251_v40  ;;  %v1784_v40 = vld [vmem:[%s5541_s13 + $0x160] sm:$0xff] }
 0x8f0   :  { %v3290_v33 = vpack.c.bf16 %v1785_v31, %v1784_v40  ;;  %v1585_v13 = vrot.slane %v2648_v27, %v5004_v12  ;;  %v2145_v40 = vld [vmem:[%s5538_s10 + $0x98] sm:$0xff]  ;;  %v2148_v31 = vld [vmem:[%s5538_s10 + $0xb0] sm:$0xff] }
 0x8f2   :  { %3254 = vmatpush3.bf16.msra.mxu1 %v3253_v16  ;;  %v3293_v16 = vpack.c.bf16 %v1787_v15, %v1786_v51  ;;  %v2144_v51 = vld [vmem:[%s5538_s10 + $0x90] sm:$0xff]  ;;  %v2147_v15 = vld [vmem:[%s5538_s10 + $0xa8] sm:$0xff] }
 0x8f3   :  { %3256 = vmatprep.subr.bf16.mxu1 %v3255_v17 }
 0x8f6   :  { %3258 = vmatpush3.bf16.msra.mxu1 %v3257_v53  ;;  %v3295_v53 = vpack.c.bf16 %v1932_v45, %v1929_v19  ;;  %v3316_v19 = vpack.c.bf16 %v2147_v15, %v2144_v51 }
 0x8f7   :  { %3260 = vmatprep.subr.bf16.mxu1 %v3259_v57  ;;  %v1931_v57 = vld [vmem:[#allocation5 + $0x18] sm:$0xff] }
 0x8f8   :  { %v3297_v2 = vpack.c.bf16 %v1931_v57, %v1928_v47  ;;  %3296 = vmatprep.subr.bf16.mxu0 %v3295_v53  ;;  %v2150_v47 = vld [vmem:[%s5538_s10 + $0xc0] sm:$0xff]  ;;  %v2153_v53 = vld [vmem:[%s5538_s10 + $0xd8] sm:$0xff] }
 0x8f9   :  { %v2157_v57 = vld [vmem:[%s5538_s10 + $0xf8] sm:$0xff]  ;;  %v3320_v5 = vpack.c.bf16 %v2153_v53, %v2150_v47  ;;  %v2202_v47 = vld [vmem:[%s5538_s10 + $0x260] sm:$0xff]  ;;  %v2200_v53 = vld [vmem:[%s5538_s10 + $0x250] sm:$0xff] }
 0x8fa   :  { %3262 = vmatpush3.bf16.msra.mxu1 %v3261_v43  ;;  %3298 = vmatpush1.bf16.msra.mxu0 %v3297_v2  ;;  %v2128_v43 = vld [vmem:[%s5538_s10 + $0x10] sm:$0xff] }
 0x8fb   :  { %3264 = vmatprep.subr.bf16.mxu1 %v3263_v36  ;;  %3299 = vmatprep.subr.bf16.mxu0 %v3571_v44  ;;  %v2131_v36 = vld [vmem:[%s5538_s10 + $0x28] sm:$0xff]  ;;  %v2160_v2 = vld [vmem:[%s5538_s10 + $0x110] sm:$0xff] }
 0x8fc   :  { %v3400_v38 = vpack.c.bf16 %v2131_v36, %v2128_v43  ;;  %v3322_v11 = vpack.c.bf16 %v2160_v2, %v2157_v57  ;;  %v2159_v43 = vld [vmem:[%s5538_s10 + $0x108] sm:$0xff] }
 0x8fd   :  { %v2163_v36 = vld [vmem:[%s5538_s10 + $0x128] sm:$0xff] }
 0x8fe   :  { %3266 = vmatpush3.bf16.msra.mxu1 %v3265_v20  ;;  %v2185_v20 = vld [vmem:[%s5538_s10 + $0x1d8] sm:$0xff]  ;;  %v2203_v2 = vld [vmem:[%s5538_s10 + $0x268] sm:$0xff] }
 0x8ff   :  { %3268 = vmatprep.subr.bf16.mxu1 %v3267_v23  ;;  %v3402_v21 = vpack.c.bf16 %v2185_v20, %v2182_v49  ;;  %v2137_v23 = vld [vmem:[%s5538_s10 + $0x58] sm:$0xff] }
 0x900   :  { %v3404_v24 = vpack.c.bf16 %v2137_v23, %v2134_v22  ;;  %v2165_v22 = vld [vmem:[%s5538_s10 + $0x138] sm:$0xff] }
 0x901   :  { %v2169_v23 = vld [vmem:[%s5538_s10 + $0x158] sm:$0xff] }
 0x902   :  { %3270 = vmatpush3.bf16.msra.mxu1 %v3269_v26  ;;  %v2191_v26 = vld [vmem:[%s5538_s10 + $0x208] sm:$0xff] }
 0x903   :  { %3271 = vmatprep.subr.bf16.mxu1 %v3571_v44  ;;  %v3406_v27 = vpack.c.bf16 %v2191_v26, %v2188_v25 }
 0x9b8   :  { %v1658_v34 = vpop.f32.mrb[12].mxu1  ;;  %v1729_v55 = vpop.f32.mrb[10].mxu0 }
 0x9b9   :  { %v4953_v9 = vadd.f32 %v1658_v34, %v1577_v28  ;;  %v1660_v29 = vpop.f32.mrb[13].mxu1  ;;  %v1731_v30 = vpop.f32.mrb[11].mxu0  ;;  %v5021_v17 = vadd.f32 %v1729_v55, %v1585_v13  ;;  %v1930_v55 = vld [vmem:[#allocation5 + $0x10] sm:$0xff]  ;;  %v3314_v13 = vpack.c.bf16 %v2148_v31, %v2145_v40 }
 0x9ba   :  { %v4961_v4 = vadd.f32 %v1660_v29, %v1581_v32  ;;  %v1933_v29 = vld [vmem:[#allocation5 + $0x28] sm:$0xff]  ;;  %v2127_v30 = vld [vmem:[%s5538_s10 + $0x8] sm:$0xff]  ;;  %v2197_v31 = vld [vmem:[%s5538_s10 + $0x238] sm:$0xff] }
 0x9bb   :  { %v1737_v8 = vmul.f32 %v4953_v9, %v4953_v9  ;;  %v1739_v18 = vmul.f32 %v5021_v17, %v5021_v17  ;;  %v3302_v62 = vpack.c.bf16 %v2130_v58, %v2127_v30  ;;  %v2174_v30 = vld [vmem:[%s5538_s10 + $0x180] sm:$0xff]  ;;  %v2177_v58 = vld [vmem:[%s5538_s10 + $0x198] sm:$0xff] }
 0x9bc   :  { %v1738_v60 = vmul.f32 %v4961_v4, %v4961_v4 }
 0x9be   :  { %1852 = vmatprep.mubr.f32.mxu1 %v1738_v60  ;;  %v3300_v60 = vpack.c.bf16 %v1933_v29, %v1930_v55 }
 0x9bf   :  { %1853 = vmatmul.mubr.f32.vlgmr.msra.gmra.mrb[14].mxu1 %v1737_v8 }
 0x9c0   :  { %3273 = vmatpush3.bf16.msra.mxu1 %v3272_v35  ;;  %2798 = vmatprep.mubr.msk.f32.mxu1 %vm3572_vm4, %v3570_v0 }
 0x9c1   :  { %3274 = vmatprep.subr.bf16.mxu1 %v3571_v44 }
 0x9c4   :  { %3276 = vmatpush3.bf16.msra.mxu1 %v3275_v39  ;;  %v2129_v39 = vld [vmem:[%s5538_s10 + $0x18] sm:$0xff] }
 0x9c5   :  { %3277 = vmatprep.subr.bf16.mxu1 %v3571_v44 }
 0x9c8   :  { %3279 = vmatpush3.bf16.msra.mxu1 %v3278_v46  ;;  %v3304_v46 = vpack.c.bf16 %v2129_v39, %v2126_v37  ;;  %v2183_v37 = vld [vmem:[%s5538_s10 + $0x1c8] sm:$0xff] }
 0x9c9   :  { %3280 = vmatprep.subr.bf16.mxu1 %v3571_v44  ;;  %v2187_v39 = vld [vmem:[%s5538_s10 + $0x1e8] sm:$0xff] }
 0x9cc   :  { %3282 = vmatpush3.bf16.msra.mxu1 %v3281_v59  ;;  %v2135_v59 = vld [vmem:[%s5538_s10 + $0x48] sm:$0xff] }
 0x9cd   :  { %3283 = vmatprep.subr.bf16.mxu1 %v3571_v44 }
 0x9d0   :  { %3285 = vmatpush3.bf16.msra.mxu1 %v3284_v3  ;;  %v3308_v3 = vpack.c.bf16 %v2135_v59, %v2132_v56  ;;  %v2189_v56 = vld [vmem:[%s5538_s10 + $0x1f8] sm:$0xff]  ;;  %v2140_v59 = vld [vmem:[%s5538_s10 + $0x70] sm:$0xff] }
 0x9d1   :  { %3286 = vmatprep.subr.bf16.mxu1 %v3571_v44 }
 0x9d4   :  { %3288 = vmatpush3.bf16.msra.mxu1 %v3287_v10  ;;  %v2141_v10 = vld [vmem:[%s5538_s10 + $0x78] sm:$0xff] }
 0x9d5   :  { %3289 = vmatprep.subr.bf16.mxu1 %v3571_v44 }
 0x9d8   :  { %3291 = vmatpush3.bf16.msra.mxu1 %v3290_v33  ;;  %v3312_v33 = vpack.c.bf16 %v2141_v10, %v2138_v7  ;;  %v2196_v7 = vld [vmem:[%s5538_s10 + $0x230] sm:$0xff]  ;;  %v2194_v10 = vld [vmem:[%s5538_s10 + $0x220] sm:$0xff] }
 0x9d9   :  { %3292 = vmatprep.subr.bf16.mxu1 %v3571_v44  ;;  %v3410_v51 = vpack.c.bf16 %v2197_v31, %v2194_v10  ;;  %v2173_v10 = vld [vmem:[%s5538_s10 + $0x178] sm:$0xff] }
 0x9dc   :  { %3294 = vmatpush3.bf16.msra.mxu1 %v3293_v16  ;;  %v2151_v16 = vld [vmem:[%s5538_s10 + $0xc8] sm:$0xff] }
 0x9dd   :  { %3399 = vmatprep.subr.bf16.mxu1 %v3398_v14  ;;  %v2156_v14 = vld [vmem:[%s5538_s10 + $0xf0] sm:$0xff] }
 0x9de   :  { %v3324_v49 = vpack.c.bf16 %v2159_v43, %v2156_v14  ;;  %v3414_v14 = vpack.c.bf16 %v2203_v2, %v2200_v53  ;;  %v5329_v53 = vld [vmem:[%s5543_s15 + $0x1e] ss:$8 sm:$0x7] }
 0x9df   :  { %2799 = vmatmul.mubr.f32.vlgmr.msra.gmra.mrb[16].mxu1 %v1739_v18  ;;  %v2154_v18 = vld [vmem:[%s5538_s10 + $0xe0] sm:$0xff]  ;;  %v2089_v2 = vrot.slane %v5329_v53, %v3800_v52 }
 0x9e0   :  { %3401 = vmatpush3.bf16.msra.mxu1 %v3400_v38  ;;  %v3318_v45 = vpack.c.bf16 %v2154_v18, %v2151_v16  ;;  %v2166_v38 = vld [vmem:[%s5538_s10 + $0x140] sm:$0xff]  ;;  %v2149_v18 = vld [vmem:[%s5538_s10 + $0xb8] sm:$0xff] }
 0x9e1   :  { %3403 = vmatprep.subr.bf16.mxu1 %v3402_v21  ;;  %v3326_v20 = vpack.c.bf16 %v2166_v38, %v2163_v36  ;;  %v2162_v21 = vld [vmem:[%s5538_s10 + $0x120] sm:$0xff]  ;;  %v2152_v36 = vld [vmem:[%s5538_s10 + $0xd0] sm:$0xff]  ;;  %v2155_v38 = vld [vmem:[%s5538_s10 + $0xe8] sm:$0xff] }
 0x9e2   :  { %v3328_v25 = vpack.c.bf16 %v2165_v22, %v2162_v21  ;;  %v2146_v16 = vld [vmem:[%s5538_s10 + $0xa0] sm:$0xff]  ;;  %v2208_v21 = vld [vmem:[%s5538_s10 + $0x290] sm:$0xff] }
 0x9e3   :  { %v2206_v22 = vld [vmem:[%s5538_s10 + $0x280] sm:$0xff] }
 0x9e4   :  { %3405 = vmatpush3.bf16.msra.mxu1 %v3404_v24  ;;  %v2172_v24 = vld [vmem:[%s5538_s10 + $0x170] sm:$0xff] }
 0x9e5   :  { %3407 = vmatprep.subr.bf16.mxu1 %v3406_v27  ;;  %v3330_v26 = vpack.c.bf16 %v2172_v24, %v2169_v23  ;;  %v2168_v27 = vld [vmem:[%s5538_s10 + $0x150] sm:$0xff]  ;;  %v2209_v24 = vld [vmem:[%s5538_s10 + $0x298] sm:$0xff] }
 0xa92   :  { %v2691_v28 = vpop.f32.mrb[14].mxu1 }
 0xa93   :  { %v2692_v32 = vpop.f32.mrb[15].mxu1 }
 0xa94   :  { %v2693_v34 = vadd.f32 %v2692_v32, %v2691_v28  ;;  %v2171_v28 = vld [vmem:[%s5538_s10 + $0x168] sm:$0xff] }
 0xa95   :  { %v2175_v32 = vld [vmem:[%s5538_s10 + $0x188] sm:$0xff]  ;;  %v3332_v55 = vpack.c.bf16 %v2171_v28, %v2168_v27  ;;  %v3418_v27 = vpack.c.bf16 %v2209_v24, %v2206_v22  ;;  %v2222_v22 = vld [vmem:[%s5538_s10 + $0x300] sm:$0xff]  ;;  %v2225_v24 = vld [vmem:[%s5538_s10 + $0x318] sm:$0xff] }
 0xab2   :  { %v1924_v1 = vpop.f32.mrb[16].mxu1 }
 0xab3   :  { %v1925_v35 = vadd.f32 %v2693_v34, %v1924_v1  ;;  %v2800_v8 = vpop.f32.mrb[17].mxu1  ;;  %v2178_v34 = vld [vmem:[%s5538_s10 + $0x1a0] sm:$0xff]  ;;  %v2181_v1 = vld [vmem:[%s5538_s10 + $0x1b8] sm:$0xff] }
 0xab4   :  { %v3334_v29 = vpack.c.bf16 %v2178_v34, %v2175_v32  ;;  %v2158_v32 = vld [vmem:[%s5538_s10 + $0x100] sm:$0xff]  ;;  %v2161_v34 = vld [vmem:[%s5538_s10 + $0x118] sm:$0xff] }
 0xab5   :  { %2653 = vmatmul.mubr.msk.f32.vlgmr.msra.gmra.mrb[12].mxu0 %vm1934_vm5, %v1925_v35 }
 0xab6   :  { %3301 = vmatpush3.bf16.msra.mxu0 %v3300_v60  ;;  %2805 = vmatprep.mubr.msk.f32.mxu0 %vm3572_vm4, %v3570_v0  ;;  %v2184_v60 = vld [vmem:[%s5538_s10 + $0x1d0] sm:$0xff] }
 0xab7   :  { %3303 = vmatprep.subr.bf16.mxu0 %v3302_v62  ;;  %v3338_v8 = vpack.c.bf16 %v2184_v60, %v2181_v1  ;;  %v2180_v62 = vld [vmem:[%s5538_s10 + $0x1b0] sm:$0xff]  ;;  %v2215_v1 = vld [vmem:[%s5538_s10 + $0x2c8] sm:$0xff] }
 0xab8   :  { %v3340_v42 = vpack.c.bf16 %v2183_v37, %v2180_v62  ;;  %v2213_v62 = vld [vmem:[%s5538_s10 + $0x2b8] sm:$0xff]  ;;  %v2164_v37 = vld [vmem:[%s5538_s10 + $0x130] sm:$0xff] }
 0xab9   :  { %2806 = vmatmul.mubr.msk.f32.vlgmr.msra.gmra.mrb[14].mxu0 %vm1934_vm5, %v1925_v35  ;;  %v3336_v35 = vpack.c.bf16 %v2177_v58, %v2174_v30  ;;  %v2214_v30 = vld [vmem:[%s5538_s10 + $0x2c0] sm:$0xff]  ;;  %v2212_v58 = vld [vmem:[%s5538_s10 + $0x2b0] sm:$0xff] }
 0xaba   :  { %3305 = vmatpush1.bf16.msra.mxu0 %v3304_v46  ;;  %v3342_v46 = vpack.c.bf16 %v2190_v41, %v2187_v39  ;;  %v2167_v41 = vld [vmem:[%s5538_s10 + $0x148] sm:$0xff] }
 0xabb   :  { %3307 = vmatprep.subr.bf16.mxu0 %v3306_v48  ;;  %v2186_v48 = vld [vmem:[%s5538_s10 + $0x1e0] sm:$0xff] }
 0xabc   :  { %v3344_v61 = vpack.c.bf16 %v2189_v56, %v2186_v48  ;;  %v3424_v48 = vpack.c.bf16 %v2167_v41, %v2164_v37  ;;  %v2234_v41 = vld [vmem:[%s5538_s10 + $0x360] sm:$0xff] }
 0xabe   :  { %3309 = vmatpush1.bf16.msra.mxu0 %v3308_v3  ;;  %v3408_v3 = vpack.c.bf16 %v2143_v63, %v2140_v59  ;;  %v2218_v59 = vld [vmem:[%s5538_s10 + $0x2e0] sm:$0xff]  ;;  %v2216_v63 = vld [vmem:[%s5538_s10 + $0x2d0] sm:$0xff] }
 0xabf   :  { %3311 = vmatprep.subr.bf16.mxu0 %v3310_v6  ;;  %v2193_v6 = vld [vmem:[%s5538_s10 + $0x218] sm:$0xff] }
 0xac0   :  { %3409 = vmatpush3.bf16.msra.mxu1 %v3408_v3  ;;  %v3346_v40 = vpack.c.bf16 %v2196_v7, %v2193_v6  ;;  %v2219_v6 = vld [vmem:[%s5538_s10 + $0x2e8] sm:$0xff]  ;;  %v2170_v7 = vld [vmem:[%s5538_s10 + $0x160] sm:$0xff] }
 0xac1   :  { %3411 = vmatprep.subr.bf16.mxu1 %v3410_v51  ;;  %v3428_v31 = vpack.c.bf16 %v2173_v10, %v2170_v7  ;;  %v2243_v10 = vld [vmem:[%s5538_s10 + $0x3a8] sm:$0xff] }
 0xac2   :  { %3313 = vmatpush1.bf16.msra.mxu0 %v3312_v33  ;;  %v2192_v33 = vld [vmem:[%s5538_s10 + $0x210] sm:$0xff] }
 0xac3   :  { %3315 = vmatprep.subr.bf16.mxu0 %v3314_v13  ;;  %v2195_v13 = vld [vmem:[%s5538_s10 + $0x228] sm:$0xff] }
 0xac4   :  { %v3348_v15 = vpack.c.bf16 %v2195_v13, %v2192_v33  ;;  %v2223_v33 = vld [vmem:[%s5538_s10 + $0x308] sm:$0xff]  ;;  %v2226_v13 = vld [vmem:[%s5538_s10 + $0x320] sm:$0xff] }
 0xac5   :  { %v3366_v51 = vpack.c.bf16 %v2226_v13, %v2223_v33  ;;  %v2250_v33 = vld [vmem:[%s5538_s10 + $0x3e0] sm:$0xff] }
 0xac6   :  { %3317 = vmatpush1.bf16.msra.mxu0 %v3316_v19  ;;  %v3412_v19 = vpack.c.bf16 %v2149_v18, %v2146_v16 }
 0xac7   :  { %3319 = vmatprep.subr.bf16.mxu0 %v3318_v45  ;;  %v2199_v45 = vld [vmem:[%s5538_s10 + $0x248] sm:$0xff] }
 0xac8   :  { %3413 = vmatpush3.bf16.msra.mxu1 %v3412_v19  ;;  %v3350_v57 = vpack.c.bf16 %v2202_v47, %v2199_v45 }
 0xac9   :  { %3415 = vmatprep.subr.bf16.mxu1 %v3414_v14 }
 0xaca   :  { %3321 = vmatpush1.bf16.msra.mxu0 %v3320_v5  ;;  %v2198_v5 = vld [vmem:[%s5538_s10 + $0x240] sm:$0xff] }
 0xacb   :  { %3323 = vmatprep.subr.bf16.mxu0 %v3322_v11  ;;  %v2201_v11 = vld [vmem:[%s5538_s10 + $0x258] sm:$0xff] }
 0xacc   :  { %v3352_v43 = vpack.c.bf16 %v2201_v11, %v2198_v5  ;;  %v2093_v11 = vrot.slane %v5329_v53, %v3806_v54 }
 0xace   :  { %3325 = vmatpush1.bf16.msra.mxu0 %v3324_v49  ;;  %v3416_v49 = vpack.c.bf16 %v2155_v38, %v2152_v36 }
 0xacf   :  { %3327 = vmatprep.subr.bf16.mxu0 %v3326_v20  ;;  %v2205_v20 = vld [vmem:[%s5538_s10 + $0x278] sm:$0xff] }
 0xad0   :  { %v3354_v23 = vpack.c.bf16 %v2208_v21, %v2205_v20  ;;  %3417 = vmatpush3.bf16.msra.mxu1 %v3416_v49 }
 0xad1   :  { %3419 = vmatprep.subr.bf16.mxu1 %v3418_v27  ;;  %v2232_v27 = vld [vmem:[%s5538_s10 + $0x350] sm:$0xff] }
 0xad2   :  { %3329 = vmatpush1.bf16.msra.mxu0 %v3328_v25  ;;  %v2204_v25 = vld [vmem:[%s5538_s10 + $0x270] sm:$0xff] }
 0xad3   :  { %3331 = vmatprep.subr.bf16.mxu0 %v3330_v26  ;;  %v2207_v26 = vld [vmem:[%s5538_s10 + $0x288] sm:$0xff] }
 0xad4   :  { %v3356_v28 = vpack.c.bf16 %v2207_v26, %v2204_v25  ;;  %v2229_v26 = vld [vmem:[%s5538_s10 + $0x338] sm:$0xff] }
 0xad6   :  { %3333 = vmatpush1.bf16.msra.mxu0 %v3332_v55  ;;  %v2211_v55 = vld [vmem:[%s5538_s10 + $0x2a8] sm:$0xff] }
 0xad7   :  { %3335 = vmatprep.subr.bf16.mxu0 %v3334_v29  ;;  %v3420_v29 = vpack.c.bf16 %v2161_v34, %v2158_v32  ;;  %v3358_v60 = vpack.c.bf16 %v2214_v30, %v2211_v55  ;;  %v3368_v32 = vpack.c.bf16 %v2225_v24, %v2222_v22  ;;  %v2228_v55 = vld [vmem:[%s5538_s10 + $0x330] sm:$0xff]  ;;  %v3370_v30 = vpack.c.bf16 %v2232_v27, %v2229_v26  ;;  %v2262_v22 = vld [vmem:[%s5538_s10 + $0x440] sm:$0xff]  ;;  %v2263_v27 = vld [vmem:[%s5538_s10 + $0x448] sm:$0xff] }
 0xad8   :  { %v2260_v26 = vld [vmem:[%s5538_s10 + $0x430] sm:$0xff] }
 0xad9   :  { %3421 = vmatpush3.bf16.msra.mxu1 %v3420_v29 }
 0xada   :  { %3337 = vmatpush1.bf16.msra.mxu0 %v3336_v35  ;;  %v3422_v35 = vpack.c.bf16 %v2215_v1, %v2212_v58  ;;  %v2231_v58 = vld [vmem:[%s5538_s10 + $0x348] sm:$0xff]  ;;  %v2230_v1 = vld [vmem:[%s5538_s10 + $0x340] sm:$0xff] }
 0xadb   :  { %3339 = vmatprep.subr.bf16.mxu0 %v3338_v8  ;;  %v2210_v8 = vld [vmem:[%s5538_s10 + $0x2a0] sm:$0xff]  ;;  %v3372_v37 = vpack.c.bf16 %v2231_v58, %v2228_v55  ;;  %v2268_v55 = vld [vmem:[%s5538_s10 + $0x470] sm:$0xff] }
 0xadc   :  { %v3360_v39 = vpack.c.bf16 %v2213_v62, %v2210_v8  ;;  %3423 = vmatprep.subr.bf16.mxu1 %v3422_v35  ;;  %v2235_v35 = vld [vmem:[%s5538_s10 + $0x368] sm:$0xff]  ;;  %v2238_v8 = vld [vmem:[%s5538_s10 + $0x380] sm:$0xff]  ;;  %v2264_v58 = vld [vmem:[%s5538_s10 + $0x450] sm:$0xff] }
 0xadd   :  { %3425 = vmatpush3.bf16.msra.mxu1 %v3424_v48  ;;  %v2236_v48 = vld [vmem:[%s5538_s10 + $0x370] sm:$0xff] }
 0xade   :  { %3341 = vmatpush1.bf16.msra.mxu0 %v3340_v42  ;;  %v2217_v42 = vld [vmem:[%s5538_s10 + $0x2d8] sm:$0xff] }
 0xadf   :  { %3343 = vmatprep.subr.bf16.mxu0 %v3342_v46  ;;  %v2220_v46 = vld [vmem:[%s5538_s10 + $0x2f0] sm:$0xff] }
 0xae0   :  { %v3362_v56 = vpack.c.bf16 %v2220_v46, %v2217_v42  ;;  %v3374_v42 = vpack.c.bf16 %v2238_v8, %v2235_v35  ;;  %v2237_v46 = vld [vmem:[%s5538_s10 + $0x378] sm:$0xff] }
 0xae2   :  { %3345 = vmatpush1.bf16.msra.mxu0 %v3344_v61  ;;  %v2221_v61 = vld [vmem:[%s5538_s10 + $0x2f8] sm:$0xff] }
 0xae3   :  { %3347 = vmatprep.subr.bf16.mxu0 %v3346_v40  ;;  %v3426_v3 = vpack.c.bf16 %v2221_v61, %v2218_v59  ;;  %v3364_v40 = vpack.c.bf16 %v2219_v6, %v2216_v63  ;;  %v2241_v59 = vld [vmem:[%s5538_s10 + $0x398] sm:$0xff]  ;;  %v2244_v61 = vld [vmem:[%s5538_s10 + $0x3b0] sm:$0xff]  ;;  %v3376_v63 = vpack.c.bf16 %v2237_v46, %v2234_v41 }
 0xae4   :  { %v2240_v6 = vld [vmem:[%s5538_s10 + $0x390] sm:$0xff]  ;;  %v3378_v7 = vpack.c.bf16 %v2244_v61, %v2241_v59 }
 0xae5   :  { %3427 = vmatprep.subr.bf16.mxu1 %v3426_v3  ;;  %v3380_v13 = vpack.c.bf16 %v2243_v10, %v2240_v6 }
 0xae6   :  { %3349 = vmatpush1.bf16.msra.mxu0 %v3348_v15  ;;  %3429 = vmatpush3.bf16.msra.mxu1 %v3428_v31  ;;  %v2247_v31 = vld [vmem:[%s5538_s10 + $0x3c8] sm:$0xff] }
 0xae7   :  { %3351 = vmatprep.subr.bf16.mxu0 %v3350_v57  ;;  %3430 = vmatprep.subr.bf16.mxu1 %v3571_v44  ;;  %v5334_v57 = vld [vmem:[%s5543_s15 + $0x1f] ss:$8 sm:$0x7] }
 0xae8   :  { %v2108_v36 = vrot.slane %v5334_v57, %v3800_v52  ;;  %v2112_v49 = vrot.slane %v5334_v57, %v3806_v54  ;;  %v2116_v8 = vrot.slane %v5334_v57, %v5004_v12 }
 0xaea   :  { %3353 = vmatpush1.bf16.msra.mxu0 %v3352_v43 }
 0xaeb   :  { %3355 = vmatprep.subr.bf16.mxu0 %v3354_v23 }
 0xaee   :  { %3357 = vmatpush1.bf16.msra.mxu0 %v3356_v28 }
 0xaef   :  { %3359 = vmatprep.subr.bf16.mxu0 %v3358_v60  ;;  %v2233_v60 = vld [vmem:[%s5538_s10 + $0x358] sm:$0xff] }
 0xaf2   :  { %3361 = vmatpush1.bf16.msra.mxu0 %v3360_v39  ;;  %v3434_v39 = vpack.c.bf16 %v2233_v60, %v2230_v1  ;;  %v2266_v1 = vld [vmem:[%s5538_s10 + $0x460] sm:$0xff]  ;;  %v2269_v60 = vld [vmem:[%s5538_s10 + $0x478] sm:$0xff] }
 0xaf3   :  { %3363 = vmatprep.subr.bf16.mxu0 %v3362_v56  ;;  %v2239_v56 = vld [vmem:[%s5538_s10 + $0x388] sm:$0xff] }
 0xaf4   :  { %v3437_v3 = vpack.c.bf16 %v2239_v56, %v2236_v48 }
 0xaf6   :  { %3365 = vmatpush1.bf16.msra.mxu0 %v3364_v40  ;;  %v2245_v40 = vld [vmem:[%s5538_s10 + $0x3b8] sm:$0xff] }
 0xaf7   :  { %3367 = vmatprep.subr.bf16.mxu0 %v3366_v51 }
 0xb88   :  { %v2004_v15 = vpop.f32.mrb[12].mxu0 }
 0xb89   :  { %v2005_v16 = vadd.f32 1e-05, %v2004_v15  ;;  %v2006_v18 = vpop.f32.mrb[13].mxu0  ;;  %v2246_v15 = vld [vmem:[%s5538_s10 + $0x3c0] sm:$0xff] }
 0xb8a   :  { %v2007_v19 = vadd.f32 1e-05, %v2006_v18  ;;  %v2249_v18 = vld [vmem:[%s5538_s10 + $0x3d8] sm:$0xff] }
 0xb8b   :  { %3484 = vrsqrt.f32 %v2005_v16  ;;  %v3382_v16 = vpack.c.bf16 %v2250_v33, %v2247_v31 }
 0xb8c   :  { %3486 = vrsqrt.f32 %v2007_v19  ;;  %v2075_v45 = vpop.f32.mrb[14].mxu0  ;;  %v2248_v19 = vld [vmem:[%s5538_s10 + $0x3d0] sm:$0xff] }
 0xb8d   :  { %v2807_v47 = vpop.f32.mrb[15].mxu0  ;;  %v2076_v62 = vadd.f32 1e-05, %v2075_v45  ;;  %v2251_v45 = vld [vmem:[%s5538_s10 + $0x3e8] sm:$0xff] }
 0xb8e   :  { %v2253_v47 = vld [vmem:[%s5538_s10 + $0x3f8] sm:$0xff] }
 0xb8f   :  { %3488 = vrsqrt.f32 %v2076_v62 }
 0xb95   :  { %v3485_v5 = vpop.eup %3484 }
 0xb96   :  { %v3487_v14 = vpop.eup %3486  ;;  %v2082_v43 = vmul.f32 %v3485_v5, %v4953_v9  ;;  %v2224_v9 = vld [vmem:[%s5538_s10 + $0x310] sm:$0xff]  ;;  %v3384_v5 = vpack.c.bf16 %v2249_v18, %v2246_v15 }
 0xb97   :  { %v2083_v38 = vmul.f32 %v3487_v14, %v4961_v4  ;;  %v2227_v4 = vld [vmem:[%s5538_s10 + $0x328] sm:$0xff]  ;;  %v2252_v14 = vld [vmem:[%s5538_s10 + $0x3f0] sm:$0xff] }
 0xb98   :  { %v2101_v20 = vmul.f32 %v2089_v2, %v2082_v43  ;;  %v3431_v34 = vpack.c.bf16 %v2227_v4, %v2224_v9  ;;  %v2256_v2 = vld [vmem:[%s5538_s10 + $0x410] sm:$0xff]  ;;  %v2258_v9 = vld [vmem:[%s5538_s10 + $0x420] sm:$0xff] }
 0xb99   :  { %v2102_v21 = vmul.f32 %v2093_v11, %v2083_v38  ;;  %v3443_v11 = vpack.c.bf16 %v2251_v45, %v2248_v19  ;;  %v3386_v43 = vpack.c.bf16 %v2256_v2, %v2253_v47  ;;  %v2254_v38 = vld [vmem:[%s5538_s10 + $0x400] sm:$0xff] }
 0xb9a   :  { %v2120_v23 = vadd.f32 %v2108_v36, %v2101_v20  ;;  %v2255_v36 = vld [vmem:[%s5538_s10 + $0x408] sm:$0xff]  ;;  %v3489_v20 = vpop.eup %3488 }
 0xb9b   :  { %v2121_v25 = vadd.f32 %v2112_v49, %v2102_v21  ;;  %v2257_v49 = vld [vmem:[%s5538_s10 + $0x418] sm:$0xff]  ;;  %v2259_v21 = vld [vmem:[%s5538_s10 + $0x428] sm:$0xff] }
 0xb9c   :  { %v2123_v29 = vmax.f32 %v2120_v23, 0.0  ;;  %v3388_v23 = vpack.c.bf16 %v2255_v36, %v2252_v14  ;;  %v3446_v24 = vpack.c.bf16 %v2257_v49, %v2254_v38  ;;  %v3390_v4 = vpack.c.bf16 %v2262_v22, %v2259_v21 }
 0xb9d   :  { %v2124_v28 = vmax.f32 %v2121_v25, 0.0  ;;  %v2261_v25 = vld [vmem:[%s5538_s10 + $0x438] sm:$0xff] }
 0xb9f   :  { %2352 = vmatprep.mubr.f32.mxu0 %v2124_v28  ;;  %2494 = vmatprep.mubr.f32.mxu1 %v2124_v28  ;;  %v2084_v28 = vmul.f32 %v3489_v20, %v5021_v17 }
 0xba0   :  { %2353 = vmatmul.mubr.f32.vlgmr.msra.gmra.mrb[16].mxu0 %v2123_v29  ;;  %2495 = vmatmul.mubr.f32.vlgmr.msra.gmra.mrb[18].mxu1 %v2123_v29  ;;  %v3392_v29 = vpack.c.bf16 %v2261_v25, %v2258_v9 }
 0xba1   :  { %3369 = vmatpush1.bf16.msra.mxu0 %v3368_v32  ;;  %3432 = vmatpush3.bf16.msra.mxu1 %v3431_v34  ;;  %v2097_v32 = vrot.slane %v5329_v53, %v5004_v12  ;;  %v2265_v34 = vld [vmem:[%s5538_s10 + $0x458] sm:$0xff]  ;;  %v2267_v53 = vld [vmem:[%s5538_s10 + $0x468] sm:$0xff] }
 0xba2   :  { %3371 = vmatprep.subr.bf16.mxu0 %v3370_v30  ;;  %3433 = vmatprep.subr.bf16.mxu1 %v3571_v44  ;;  %v3449_v30 = vpack.c.bf16 %v2263_v27, %v2260_v26  ;;  %v3394_v17 = vpack.c.bf16 %v2268_v55, %v2265_v34  ;;  %v3396_v62 = vpack.c.bf16 %v2267_v53, %v2264_v58 }
 0xba3   :  { %2423 = vmatprep.mubr.f32.mxu0 %v3570_v0  ;;  %2840 = vmatprep.mubr.msk.f32.mxu1 %vm3572_vm4, %v3570_v0  ;;  %v2242_v0 = vld [vmem:[%s5538_s10 + $0x3a0] sm:$0xff]  ;;  %v2103_v35 = vmul.f32 %v2097_v32, %v2084_v28  ;;  %s3538_s10 = scalar_lea.vmem %s2613_s30, 128 }
 0xba4   :  { %v3440_v51 = vpack.c.bf16 %v2245_v40, %v2242_v0  ;;  %p3539_p2 = scmp.ne.s32.totalorder %s2613_s30, %s3538_s10  ;;  %p3544_p4 = scmp.lt.s32.totalorder %s3538_s10, %s3538_s10 }
 0xba5   :  { %3373 = vmatpush1.bf16.msra.mxu0 %v3372_v37  ;;  %3435 = vmatpush3.bf16.msra.mxu1 %v3434_v39  ;;  %v3452_v37 = vpack.c.bf16 %v2269_v60, %v2266_v1  ;;  %v2122_v39 = vadd.f32 %v2116_v8, %v2103_v35 }
 0xba6   :  { %3375 = vmatprep.subr.bf16.mxu0 %v3374_v42  ;;  %3436 = vmatprep.subr.bf16.mxu1 %v3571_v44  ;;  %p3545_p5 = por %p3544_p4, %p3543_p3 }
 0xba7   :  { %v2125_v41 = vmax.f32 %v2122_v39, 0.0 }
 0xba8   :  { %p3546_p6 = pnand %p3545_p5, %p3539_p2 }
 0xba9   :  { %3377 = vmatpush1.bf16.msra.mxu0 %v3376_v63  ;;  %3438 = vmatpush3.bf16.msra.mxu1 %v3437_v3 }
 0xbaa   :  { %3379 = vmatprep.subr.bf16.mxu0 %v3378_v7  ;;  %3439 = vmatprep.subr.bf16.mxu1 %v3571_v44 }
 0xbad   :  { %3381 = vmatpush1.bf16.msra.mxu0 %v3380_v13  ;;  %3441 = vmatpush3.bf16.msra.mxu1 %v3440_v51 }
 0xbae   :  { %3383 = vmatprep.subr.bf16.mxu0 %v3382_v16  ;;  %3442 = vmatprep.subr.bf16.mxu1 %v3571_v44 }
 0xbb1   :  { %3385 = vmatpush1.bf16.msra.mxu0 %v3384_v5  ;;  %3444 = vmatpush3.bf16.msra.mxu1 %v3443_v11 }
 0xbb2   :  { %3387 = vmatprep.subr.bf16.mxu0 %v3386_v43  ;;  %3445 = vmatprep.subr.bf16.mxu1 %v3571_v44 }
 0xbb5   :  { %3389 = vmatpush1.bf16.msra.mxu0 %v3388_v23  ;;  %3447 = vmatpush3.bf16.msra.mxu1 %v3446_v24 }
 0xbb6   :  { %3391 = vmatprep.subr.bf16.mxu0 %v3390_v4  ;;  %3448 = vmatprep.subr.bf16.mxu1 %v3571_v44 }
 0xbb9   :  { %3393 = vmatpush1.bf16.msra.mxu0 %v3392_v29  ;;  %3450 = vmatpush3.bf16.msra.mxu1 %v3449_v30 }
 0xbba   :  { %3395 = vmatprep.subr.bf16.mxu0 %v3394_v17  ;;  %3451 = vmatprep.subr.bf16.mxu1 %v3571_v44 }
 0xbbd   :  { %3397 = vmatpush1.bf16.msra.mxu0 %v3396_v62  ;;  %3453 = vmatpush3.bf16.msra.mxu1 %v3452_v37 }
 0xbc0   :  { %2424 = vmatmul.mubr.f32.vlgmr.msra.gmra.mrb[16].mxu0 %v2125_v41  ;;  %2841 = vmatmul.mubr.f32.vlgmr.msra.gmra.mrb[20].mxu1 %v2125_v41 }
 0xbc1   :  { %3549 = shalt.err (!%p3546_p6)
}
 0xbc2   :  { %s3550_s1 = scalar_lea.hbm %s5545_s17, 128 }
 0xbc3   :  { %p3551_p7 = scmp.ne.s32.totalorder %s5545_s17, %s3550_s1  ;;  %p3554_p8 = scmp.lt.u32.totalorder %s3550_s1, %s5545_s17 }
 0xbc5   :  { %p3556_p9 = pnand %p3554_p8, %p3551_p7 }
 0xbc7   :  { %3559 = shalt.err (!%p3556_p9)
}
 0xbc8   :  { %2615 = dma.vmem_to_hbm [thread:$0]  %s2613_s30, 128, %s5545_s17, [#allocation4]   ;;  %v2655_v46 = vld [vmem:[%s5543_s15 + $0x30] ss:$8 sm:$0x7] }
 0xbc9   :  { %v2284_v48 = vrot.slane %v2655_v46, %v5004_v12  ;;  %v2276_v56 = vrot.slane %v2655_v46, %v3800_v52  ;;  %v2280_v59 = vrot.slane %v2655_v46, %v3806_v54  ;;  %v2571_v52 = vand.u32 127, %v94_v50 }
 0xbcb   :  { %v2572_v51 = vadd.s32 128, %v2571_v52 }
 0xbcd   :  { %vm2596_vm8 = vcmp.lt.s32.totalorder %v2572_v51, 144 }
 0xc73   :  { %v2746_v44 = vpop.f32.mrb[18].mxu1 }
 0xc74   :  { %v2747_v57 = vpop.f32.mrb[19].mxu1 }
 0xc75   :  { %v2748_v42 = vadd.f32 %v2747_v57, %v2746_v44 }
 0xc77   :  { %v2497_v61 = vadd.f32 %v2748_v42, %v2284_v48 }
 0xc93   :  { %v2425_v63 = vpop.f32.mrb[16].mxu0  ;;  %v2566_v3 = vpop.f32.mrb[20].mxu1 }
 0xc94   :  { %v3454_v6 = vadd.f32 %v2425_v63, %v2276_v56  ;;  %v2567_v7 = vadd.f32 %v2566_v3, %v2497_v61  ;;  %v2427_v10 = vpop.f32.mrb[17].mxu0  ;;  %v2842_v0 = vpop.f32.mrb[21].mxu1 }
 0xc95   :  { %v3455_v40 = vadd.f32 %v2427_v10, %v2280_v59 }
 0xc96   :  { %2601 = vst [vmem:[%s5544_s16] sm:$0xff] %v3454_v6  ;;  %v2579_v31 = vmin.f32 %v2567_v7, 0.0  ;;  %vm2576_vm6 = vcmp.gt.f32.partialorder %v2567_v7, 0.0 }
 0xc97   :  { %v2578_v33 = vmin.f32 %v3455_v40, 0.0  ;;  %vm2575_vm7 = vcmp.gt.f32.partialorder %v3455_v40, 0.0 }
 0xc98   :  { %v2584_v13 = vmul.f32 1.442695, %v2579_v31 }
 0xc99   :  { %v2582_v12 = vmul.f32 1.442695, %v2578_v33 }
 0xc9a   :  { %3490 = vpow2.f32 %v2584_v13 }
 0xc9b   :  { %3492 = vpow2.f32 %v2582_v12 }
 0xca4   :  { %v3491_v54 = vpop.eup %3490 }
 0xca5   :  { %v3493_v15 = vpop.eup %3492  ;;  %v2658_v16 = vadd.f32 -1.0, %v3491_v54 }
 0xca6   :  { %v2657_v18 = vadd.f32 -1.0, %v3493_v15 }
 0xca7   :  { %v2591_v19 = vsel %vm2576_vm6, %v2567_v7, %v2658_v16 }
 0xca8   :  { %v2594_v45 = vadd.f32 1.001, %v2591_v19  ;;  %v2590_v47 = vsel %vm2575_vm7, %v3455_v40, %v2657_v18 }
 0xca9   :  { %v2593_v2 = vadd.f32 1.001, %v2590_v47 }
 0xcaa   :  { %2603 = vst.msk [vmem:[%s5544_s16 + $0x10] sm:$0xff] %vm104_vm0, %v2594_v45 }
 0xcab   :  { %v2599_v5 = vsel %vm2596_vm8, %v3455_v40, %v2593_v2 }
 0xcac   :  { %2602 = vst [vmem:[%s5544_s16 + $0x8] sm:$0xff] %v2599_v5 }
 0xcad   :  { %3564 = dma.done.wait [#allocation4], 128  }
 0xcae   :  { %3565 = vsyncadd [#allocation4], 4294967168 }
 0xcaf   :  { %2621 = vsyncpa [#allocation3], 1 }
 0xcb0   :  { %2622 = vsyncpa [#allocation6], 1 }
 0xcb1   :  { %2623 = vsyncpa [#allocation4], 1 }

</bundles_post_ra>
